<compile_context>
chip_gen: v7x
topology: tpu7x:2x2x1
jax: 0.10.0
libtpu: 0.0.40
codegen_flags: <defaults>
</compile_context>

<pallas_src>
import functools

import jax
import jax.numpy as jnp
from jax import lax
from jax.experimental import pallas as pl
from jax.experimental.pallas import tpu as pltpu

LANE = 128


def _round_up(x, m):
    return ((x + m - 1) // m) * m


def _batch_tile(n):
    for c in range(min(8, n), 0, -1):
        if n % c == 0:
            return c
    return 1


# ----------------------------------------------------------------------------
# Fused Bottleneck kernel: one grid step == B_TILE images, everything in VMEM.
# ----------------------------------------------------------------------------
def bottleneck_uq_kernel(*refs, OH, OW, stride, has_sc):
    (x_ref, w1_ref, b1_ref, w2_ref, b2_ref, w3_ref, b3_ref) = refs[:7]
    i = 7
    xsc_ref = None
    if has_sc:
        wsc_ref, bsc_ref = refs[i], refs[i + 1]
        i += 2
        if stride != 1:
            xsc_ref = refs[i]
            i += 1
    o_ref, h1p_ref, tap_ref = refs[i], refs[i + 1], refs[i + 2]

    B, H, W, Cin = x_ref.shape
    p_p = w1_ref.shape[-1]
    Cout = w3_ref.shape[-1]

    def swin(k, size):
        # spatial window of the 3x3 conv (stride is a static Python int)
        return slice(k, k + size) if stride == 1 else pl.ds(k, size, stride)

    # Zero ONLY the 1-pixel halo of the shared conv2 scratch, once per grid
    # step (the interior is fully overwritten for every image below, and the
    # scratch is reused across the B_TILE images of this step).
    zr = jnp.zeros((1, W + 2, p_p), jnp.float32)
    zc = jnp.zeros((H, 1, p_p), jnp.float32)
    h1p_ref[0:1, :, :] = zr
    h1p_ref[H + 1:H + 2, :, :] = zr
    h1p_ref[1:H + 1, 0:1, :] = zc
    h1p_ref[1:H + 1, W + 1:W + 2, :] = zc

    for b in range(B):                         # B_TILE images, static unroll
        # ---- conv1 (1x1, BN1 scale folded) + bias + relu --------------------
        xb = x_ref[b]                                      # (H, W, Cin) bf16
        x2d = xb.reshape(H * W, Cin)
        h1 = jnp.dot(x2d, w1_ref[...], preferred_element_type=jnp.float32)
        h1 = jnp.maximum(h1 + b1_ref[...], 0.0)            # (H*W, p_p) f32
        h1p_ref[1:H + 1, 1:W + 1, :] = h1.reshape(H, W, p_p)

        # ---- conv2 (3x3, stride): stack 9 taps -> one fat-K (9*p_p) matmul --
        for kh in range(3):
            for kw in range(3):
                k = kh * 3 + kw
                tap = h1p_ref[swin(kh, OH), swin(kw, OW), :]     # (OH,OW,p_p)
                tap_ref[:, k * p_p:(k + 1) * p_p] = (
                    tap.reshape(OH * OW, p_p).astype(jnp.bfloat16))
        h2 = jnp.dot(tap_ref[...], w2_ref[...],
                     preferred_element_type=jnp.float32)
        h2 = jnp.maximum(h2 + b2_ref[...], 0.0).astype(jnp.bfloat16)

        # ---- conv3 (1x1, BN3 scale folded) + bias ---------------------------
        out = jnp.dot(h2, w3_ref[...], preferred_element_type=jnp.float32)
        out = out + b3_ref[...]                             # (OH*OW, Cout)

        # ---- shortcut -------------------------------------------------------
        if has_sc:
            xs2d = x2d if stride == 1 else xsc_ref[b].reshape(OH * OW, Cin)
            sc = jnp.dot(xs2d, wsc_ref[...],
                         preferred_element_type=jnp.float32) + bsc_ref[...]
        else:
            sc = x2d.astype(jnp.float32)                    # identity path

        # ---- residual add + final relu -> bf16 NHWC -------------------------
        o_ref[b] = jnp.maximum(out + sc, 0.0).reshape(OH, OW, Cout).astype(
            o_ref.dtype)


# ----------------------------------------------------------------------------
# Native NHWC entry point: one pallas_call per block, bf16 in / bf16 out.
# ----------------------------------------------------------------------------
def bottleneck_uq_forward_nhwc(params, x_nhwc, *, stride):
    N, H, W, Cin = x_nhwc.shape
    planes = params['conv1_w'].shape[0]
    Cout = params['conv3_w'].shape[0]              # expansion * planes
    has_sc = 'sc_w' in params
    if not has_sc:
        assert stride == 1 and Cin == Cout

    OH = (H + 2 - 3) // stride + 1
    OW = (W + 2 - 3) // stride + 1
    p_p = _round_up(planes, LANE)
    B_TILE = _batch_tile(N)
    f32 = jnp.float32

    # Activations: bf16 in HBM, no channel padding -> minimal input DMA.
    x = x_nhwc.astype(jnp.bfloat16)

    # Fold BN scales into conv weights in f32, THEN quantize to bf16.
    s1, b1 = params['bn1_s'].astype(f32), params['bn1_b'].astype(f32)
    s2, b2 = params['bn2_s'].astype(f32), params['bn2_b'].astype(f32)
    s3, b3 = params['bn3_s'].astype(f32), params['bn3_b'].astype(f32)

    w1 = params['conv1_w'].astype(f32).reshape(planes, Cin).T * s1[None, :]
    w1 = jnp.pad(w1, ((0, 0), (0, p_p - planes))).astype(jnp.bfloat16)
    b1v = jnp.pad(b1, (0, p_p - planes)).reshape(1, p_p)

    w2 = jnp.transpose(params['conv2_w'].astype(f32), (2, 3, 1, 0))
    w2 = w2.reshape(9, planes, planes) * s2[None, None, :]
    w2 = jnp.pad(w2, ((0, 0), (0, p_p - planes), (0, p_p - planes)))
    w2 = w2.reshape(9 * p_p, p_p).astype(jnp.bfloat16)     # fat-K layout
    b2v = jnp.pad(b2, (0, p_p - planes)).reshape(1, p_p)

    w3 = params['conv3_w'].astype(f32).reshape(Cout, planes).T * s3[None, :]
    w3 = jnp.pad(w3, ((0, p_p - planes), (0, 0))).astype(jnp.bfloat16)
    b3v = b3.reshape(1, Cout)

    def const_spec(shape):
        nd = len(shape)
        return pl.BlockSpec(shape, lambda n, _nd=nd: (0,) * _nd)

    args = [x, w1, b1v, w2, b2v, w3, b3v]
    in_specs = [
        pl.BlockSpec((B_TILE, H, W, Cin), lambda n: (n, 0, 0, 0)),
        const_spec((Cin, p_p)), const_spec((1, p_p)),
        const_spec((9 * p_p, p_p)), const_spec((1, p_p)),
        const_spec((p_p, Cout)), const_spec((1, Cout)),
    ]
    if has_sc:
        ssc = params['sc_bn_s'].astype(f32)
        bsc = params['sc_bn_b'].astype(f32)
        wsc = params['sc_w'].astype(f32).reshape(Cout, Cin).T * ssc[None, :]
        args += [wsc.astype(jnp.bfloat16), bsc.reshape(1, Cout)]
        in_specs += [const_spec((Cin, Cout)), const_spec((1, Cout))]
        if stride != 1:
            # Tiny pre-subsampled shortcut input: avoids strided packed reads
            # inside the kernel (OH*OW*Cin bf16 per image).
            args.append(x[:, ::stride, ::stride, :])
            in_specs.append(pl.BlockSpec((B_TILE, OH, OW, Cin),
                                         lambda n: (n, 0, 0, 0)))

    kernel = functools.partial(bottleneck_uq_kernel, OH=OH, OW=OW,
                               stride=stride, has_sc=has_sc)

    return pl.pallas_call(
        kernel,
        out_shape=jax.ShapeDtypeStruct((N, OH, OW, Cout), jnp.bfloat16),
        grid_spec=pltpu.PrefetchScalarGridSpec(
            num_scalar_prefetch=0,
            grid=(N // B_TILE,),
            in_specs=in_specs,
            out_specs=pl.BlockSpec((B_TILE, OH, OW, Cout),
                                   lambda n: (n, 0, 0, 0)),
            scratch_shapes=[
                pltpu.VMEM((H + 2, W + 2, p_p), jnp.float32),   # padded h1
                pltpu.VMEM((OH * OW, 9 * p_p), jnp.bfloat16),   # stacked taps
            ],
        ),
        compiler_params=pltpu.CompilerParams(
            dimension_semantics=("parallel",),      # megacore split on v7x
            vmem_limit_bytes=32 * 1024 * 1024,
        ),
    )(*args)


# ----------------------------------------------------------------------------
# PyTorch-compatible NCHW wrapper: layout conversion done ONCE at the block
# boundary (in a real network keep NHWC bf16 across blocks and call the
# _nhwc entry point directly).
# ----------------------------------------------------------------------------
def bottleneck_uq_forward(params, x_nchw, *, stride):
    x = jnp.transpose(x_nchw, (0, 2, 3, 1))
    y = bottleneck_uq_forward_nhwc(params, x, stride=stride)
    return jnp.transpose(y, (0, 3, 1, 2))


# ----------------------------------------------------------------------------
# Pure-JAX reference (f32) for correctness checking.
# ----------------------------------------------------------------------------
def _conv(x, w, stride, pad):
    return lax.conv_general_dilated(
        x, w, window_strides=(stride, stride),
        padding=[(pad, pad), (pad, pad)],
        dimension_numbers=('NCHW', 'OIHW', 'NCHW'),
        precision=lax.Precision.HIGHEST)


def _bn(x, scale, bias):
    return x * scale[None, :, None, None] + bias[None, :, None, None]


def reference_bottleneck(params, x, stride):
    h = jnp.maximum(_bn(_conv(x, params['conv1_w'], 1, 0),
                        params['bn1_s'], params['bn1_b']), 0.0)
    h = jnp.maximum(_bn(_conv(h, params['conv2_w'], stride, 1),
                        params['bn2_s'], params['bn2_b']), 0.0)
    h = _bn(_conv(h, params['conv3_w'], 1, 0), params['bn3_s'], params['bn3_b'])
    if 'sc_w' in params:
        sc = _bn(_conv(x, params['sc_w'], stride, 0),
                 params['sc_bn_s'], params['sc_bn_b'])
    else:
        sc = x
    return jnp.maximum(h + sc, 0.0)


# ----------------------------------------------------------------------------
# Deterministic parameter init (eval-mode folded BatchNorm).
# ----------------------------------------------------------------------------
def _init_conv(key, cout, cin, kh, kw):
    fan_in = cin * kh * kw
    return jax.random.normal(key, (cout, cin, kh, kw), jnp.float32) * (1.0 / fan_in) ** 0.5


def _init_bn(key, c, eps=1e-5):
    k1, k2, k3, k4 = jax.random.split(key, 4)
    gamma = 1.0 + 0.1 * jax.random.normal(k1, (c,), jnp.float32)
    beta = 0.1 * jax.random.normal(k2, (c,), jnp.float32)
    mean = 0.1 * jax.random.normal(k3, (c,), jnp.float32)
    var = 1.0 + 0.1 * jax.random.uniform(k4, (c,), jnp.float32)
    scale = gamma / jnp.sqrt(var + eps)
    return scale, beta - mean * scale


def init_bottleneck_params(key, in_planes, planes, stride, expansion=4):
    cout = expansion * planes
    k = jax.random.split(key, 8)
    p = {
        'conv1_w': _init_conv(k[0], planes, in_planes, 1, 1),
        'conv2_w': _init_conv(k[2], planes, planes, 3, 3),
        'conv3_w': _init_conv(k[4], cout, planes, 1, 1),
    }
    p['bn1_s'], p['bn1_b'] = _init_bn(k[1], planes)
    p['bn2_s'], p['bn2_b'] = _init_bn(k[3], planes)
    p['bn3_s'], p['bn3_b'] = _init_bn(k[5], cout)
    if stride != 1 or in_planes != cout:
        p['sc_w'] = _init_conv(k[6], cout, in_planes, 1, 1)
        p['sc_bn_s'], p['sc_bn_b'] = _init_bn(k[7], cout)
    return p


# ----------------------------------------------------------------------------
if __name__ == "__main__":
    key = jax.random.PRNGKey(0)
    kx, kp1, kp2 = jax.random.split(key, 3)
    fwd = jax.jit(bottleneck_uq_forward, static_argnames=('stride',))

    # Case 1: projection shortcut (stride=2, 16 -> 64 channels), 16x16 spatial.
    x1 = jax.random.normal(kx, (2, 16, 16, 16), jnp.float32)        # NCHW
    p1 = init_bottleneck_params(kp1, in_planes=16, planes=16, stride=2)
    y1 = fwd(p1, x1, stride=2)
    jax.block_until_ready(y1)
    r1 = reference_bottleneck(p1, x1, 2)
    y1f = y1.astype(jnp.float32)
    e1 = float(jnp.linalg.norm(y1f - r1) / (jnp.linalg.norm(r1) + 1e-12))
    assert y1.shape == (2, 64, 8, 8), y1.shape
    assert bool(jnp.all(jnp.isfinite(y1f)))
    assert e1 < 5e-2, f"relative error too large: {e1}"

    # Case 2: identity shortcut (stride=1, in_planes == expansion*planes).
    x2 = jax.random.normal(kx, (2, 32, 16, 16), jnp.float32)
    p2 = init_bottleneck_params(kp2, in_planes=32, planes=8, stride=1)
    y2 = fwd(p2, x2, stride=1)
    jax.block_until_ready(y2)
    r2 = reference_bottleneck(p2, x2, 1)
    y2f = y2.astype(jnp.float32)
    e2 = float(jnp.linalg.norm(y2f - r2) / (jnp.linalg.norm(r2) + 1e-12))
    assert y2.shape == (2, 32, 16, 16), y2.shape
    assert bool(jnp.all(jnp.isfinite(y2f)))
    assert e2 < 5e-2, f"relative error too large: {e2}"

    print("KERNEL_OK")
</pallas_src>

<mosaic_0001>
module attributes {stable_mosaic.version = 11 : i64} {
  func.func @bottleneck_uq_kernel(%arg0: i32, %arg1: memref<2x16x16x16xbf16, #tpu.memory_space<vmem>>, %arg2: memref<16x128xbf16, #tpu.memory_space<vmem>>, %arg3: memref<1x128xf32, #tpu.memory_space<vmem>>, %arg4: memref<1152x128xbf16, #tpu.memory_space<vmem>>, %arg5: memref<1x128xf32, #tpu.memory_space<vmem>>, %arg6: memref<128x64xbf16, #tpu.memory_space<vmem>>, %arg7: memref<1x64xf32, #tpu.memory_space<vmem>>, %arg8: memref<16x64xbf16, #tpu.memory_space<vmem>>, %arg9: memref<1x64xf32, #tpu.memory_space<vmem>>, %arg10: memref<2x8x8x16xbf16, #tpu.memory_space<vmem>>, %arg11: memref<2x8x8x64xbf16, #tpu.memory_space<vmem>>, %arg12: memref<18x18x128xf32, #tpu.memory_space<vmem>>, %arg13: memref<64x1152xbf16, #tpu.memory_space<vmem>>) attributes {dimension_semantics = [#tpu.dimension_semantics<parallel>], iteration_bounds = array<i64: 1>, scalar_prefetch = 0 : i64, scratch_operands = 2 : i64, tpu.core_type = #tpu.core_type<tc>, window_params = [{transform_indices = @transform_0, window_bounds = array<i64: 2, 16, 16, 16>}, {pipeline_mode = #tpu.pipeline_mode<synchronous>, transform_indices = @transform_1, window_bounds = array<i64: 16, 128>}, {pipeline_mode = #tpu.pipeline_mode<synchronous>, transform_indices = @transform_2, window_bounds = array<i64: 1, 128>}, {pipeline_mode = #tpu.pipeline_mode<synchronous>, transform_indices = @transform_3, window_bounds = array<i64: 1152, 128>}, {pipeline_mode = #tpu.pipeline_mode<synchronous>, transform_indices = @transform_4, window_bounds = array<i64: 1, 128>}, {pipeline_mode = #tpu.pipeline_mode<synchronous>, transform_indices = @transform_5, window_bounds = array<i64: 128, 64>}, {pipeline_mode = #tpu.pipeline_mode<synchronous>, transform_indices = @transform_6, window_bounds = array<i64: 1, 64>}, {pipeline_mode = #tpu.pipeline_mode<synchronous>, transform_indices = @transform_7, window_bounds = array<i64: 16, 64>}, {pipeline_mode = #tpu.pipeline_mode<synchronous>, transform_indices = @transform_8, window_bounds = array<i64: 1, 64>}, {transform_indices = @transform_9, window_bounds = array<i64: 2, 8, 8, 16>}, {transform_indices = @transform_10, window_bounds = array<i64: 2, 8, 8, 64>}]} {
    %cst = arith.constant 0.000000e+00 : f32
    %0 = vector.broadcast %cst : f32 to vector<1x18x128xf32>
    %cst_0 = arith.constant 0.000000e+00 : f32
    %1 = vector.broadcast %cst_0 : f32 to vector<16x1x128xf32>
    %c0 = arith.constant 0 : index
    %c0_1 = arith.constant 0 : index
    %c0_2 = arith.constant 0 : index
    %2 = vector.load %arg12[%c0, %c0_1, %c0_2] : memref<18x18x128xf32, #tpu.memory_space<vmem>>, vector<1x18x128xf32>
    tpu.vector_store %arg12[%c0, %c0_1, %c0_2], %0 {strides = array<i32>} : memref<18x18x128xf32, #tpu.memory_space<vmem>>, vector<1x18x128xf32>,
    %c17 = arith.constant 17 : index
    %c0_3 = arith.constant 0 : index
    %c0_4 = arith.constant 0 : index
    %3 = vector.load %arg12[%c17, %c0_3, %c0_4] : memref<18x18x128xf32, #tpu.memory_space<vmem>>, vector<1x18x128xf32>
    tpu.vector_store %arg12[%c17, %c0_3, %c0_4], %0 {strides = array<i32>} : memref<18x18x128xf32, #tpu.memory_space<vmem>>, vector<1x18x128xf32>,
    %c1 = arith.constant 1 : index
    %c0_5 = arith.constant 0 : index
    %c0_6 = arith.constant 0 : index
    %4 = vector.load %arg12[%c1, %c0_5, %c0_6] : memref<18x18x128xf32, #tpu.memory_space<vmem>>, vector<16x1x128xf32>
    tpu.vector_store %arg12[%c1, %c0_5, %c0_6], %1 {strides = array<i32>} : memref<18x18x128xf32, #tpu.memory_space<vmem>>, vector<16x1x128xf32>,
    %c1_7 = arith.constant 1 : index
    %c17_8 = arith.constant 17 : index
    %c0_9 = arith.constant 0 : index
    %5 = vector.load %arg12[%c1_7, %c17_8, %c0_9] : memref<18x18x128xf32, #tpu.memory_space<vmem>>, vector<16x1x128xf32>
    tpu.vector_store %arg12[%c1_7, %c17_8, %c0_9], %1 {strides = array<i32>} : memref<18x18x128xf32, #tpu.memory_space<vmem>>, vector<16x1x128xf32>,
    %c0_10 = arith.constant 0 : index
    %c0_11 = arith.constant 0 : index
    %c0_12 = arith.constant 0 : index
    %c0_13 = arith.constant 0 : index
    %6 = vector.load %arg1[%c0_10, %c0_11, %c0_12, %c0_13] : memref<2x16x16x16xbf16, #tpu.memory_space<vmem>>, vector<1x16x16x16xbf16>
    %7 = vector.shape_cast %6 : vector<1x16x16x16xbf16> to vector<16x16x16xbf16>
    %8 = vector.shape_cast %7 : vector<16x16x16xbf16> to vector<256x16xbf16>
    %c0_14 = arith.constant 0 : index
    %c0_15 = arith.constant 0 : index
    %9 = vector.load %arg2[%c0_14, %c0_15] : memref<16x128xbf16, #tpu.memory_space<vmem>>, vector<16x128xbf16>
    %cst_16 = arith.constant dense<0.000000e+00> : vector<256x128xf32>
    %10 = tpu.matmul %8, %9, %cst_16 {dimension_numbers = #tpu.dot_dimension_numbers<[1], [0], [0], [1], [0, 0, 1, 1], [], []>} : vector<256x16xbf16>, vector<16x128xbf16>, vector<256x128xf32> -> vector<256x128xf32>
    %c0_17 = arith.constant 0 : index
    %c0_18 = arith.constant 0 : index
    %11 = vector.load %arg3[%c0_17, %c0_18] : memref<1x128xf32, #tpu.memory_space<vmem>>, vector<1x128xf32>
    %12 = vector.broadcast %11 : vector<1x128xf32> to vector<256x128xf32>
    %13 = arith.addf %10, %12 : vector<256x128xf32>
    %cst_19 = arith.constant 0.000000e+00 : f32
    %14 = vector.broadcast %cst_19 : f32 to vector<256x128xf32>
    %15 = arith.maximumf %13, %14 : vector<256x128xf32>
    %16 = vector.shape_cast %15 : vector<256x128xf32> to vector<16x16x128xf32>
    %c1_20 = arith.constant 1 : index
    %c1_21 = arith.constant 1 : index
    %c0_22 = arith.constant 0 : index
    %17 = vector.load %arg12[%c1_20, %c1_21, %c0_22] : memref<18x18x128xf32, #tpu.memory_space<vmem>>, vector<16x16x128xf32>
    tpu.vector_store %arg12[%c1_20, %c1_21, %c0_22], %16 {strides = array<i32>} : memref<18x18x128xf32, #tpu.memory_space<vmem>>, vector<16x16x128xf32>,
    %c0_23 = arith.constant 0 : index
    %c0_24 = arith.constant 0 : index
    %c0_25 = arith.constant 0 : index
    %18 = tpu.strided_load %arg12[%c0_23, %c0_24, %c0_25] {strides = array<i32: 2, 2, 1>} : memref<18x18x128xf32, #tpu.memory_space<vmem>>, vector<8x8x128xf32>
    %19 = vector.shape_cast %18 : vector<8x8x128xf32> to vector<64x128xf32>
    %20 = arith.truncf %19 : vector<64x128xf32> to vector<64x128xbf16>
    %c0_26 = arith.constant 0 : index
    %c0_27 = arith.constant 0 : index
    %21 = vector.load %arg13[%c0_26, %c0_27] : memref<64x1152xbf16, #tpu.memory_space<vmem>>, vector<64x128xbf16>
    tpu.vector_store %arg13[%c0_26, %c0_27], %20 {strides = array<i32>} : memref<64x1152xbf16, #tpu.memory_space<vmem>>, vector<64x128xbf16>,
    %c0_28 = arith.constant 0 : index
    %c1_29 = arith.constant 1 : index
    %c0_30 = arith.constant 0 : index
    %22 = tpu.strided_load %arg12[%c0_28, %c1_29, %c0_30] {strides = array<i32: 2, 2, 1>} : memref<18x18x128xf32, #tpu.memory_space<vmem>>, vector<8x8x128xf32>
    %23 = vector.shape_cast %22 : vector<8x8x128xf32> to vector<64x128xf32>
    %24 = arith.truncf %23 : vector<64x128xf32> to vector<64x128xbf16>
    %c0_31 = arith.constant 0 : index
    %c128 = arith.constant 128 : index
    %25 = vector.load %arg13[%c0_31, %c128] : memref<64x1152xbf16, #tpu.memory_space<vmem>>, vector<64x128xbf16>
    tpu.vector_store %arg13[%c0_31, %c128], %24 {strides = array<i32>} : memref<64x1152xbf16, #tpu.memory_space<vmem>>, vector<64x128xbf16>,
    %c0_32 = arith.constant 0 : index
    %c2 = arith.constant 2 : index
    %c0_33 = arith.constant 0 : index
    %26 = tpu.strided_load %arg12[%c0_32, %c2, %c0_33] {strides = array<i32: 2, 2, 1>} : memref<18x18x128xf32, #tpu.memory_space<vmem>>, vector<8x8x128xf32>
    %27 = vector.shape_cast %26 : vector<8x8x128xf32> to vector<64x128xf32>
    %28 = arith.truncf %27 : vector<64x128xf32> to vector<64x128xbf16>
    %c0_34 = arith.constant 0 : index
    %c256 = arith.constant 256 : index
    %29 = vector.load %arg13[%c0_34, %c256] : memref<64x1152xbf16, #tpu.memory_space<vmem>>, vector<64x128xbf16>
    tpu.vector_store %arg13[%c0_34, %c256], %28 {strides = array<i32>} : memref<64x1152xbf16, #tpu.memory_space<vmem>>, vector<64x128xbf16>,
    %c1_35 = arith.constant 1 : index
    %c0_36 = arith.constant 0 : index
    %c0_37 = arith.constant 0 : index
    %30 = tpu.strided_load %arg12[%c1_35, %c0_36, %c0_37] {strides = array<i32: 2, 2, 1>} : memref<18x18x128xf32, #tpu.memory_space<vmem>>, vector<8x8x128xf32>
    %31 = vector.shape_cast %30 : vector<8x8x128xf32> to vector<64x128xf32>
    %32 = arith.truncf %31 : vector<64x128xf32> to vector<64x128xbf16>
    %c0_38 = arith.constant 0 : index
    %c384 = arith.constant 384 : index
    %33 = vector.load %arg13[%c0_38, %c384] : memref<64x1152xbf16, #tpu.memory_space<vmem>>, vector<64x128xbf16>
    tpu.vector_store %arg13[%c0_38, %c384], %32 {strides = array<i32>} : memref<64x1152xbf16, #tpu.memory_space<vmem>>, vector<64x128xbf16>,
    %c1_39 = arith.constant 1 : index
    %c1_40 = arith.constant 1 : index
    %c0_41 = arith.constant 0 : index
    %34 = tpu.strided_load %arg12[%c1_39, %c1_40, %c0_41] {strides = array<i32: 2, 2, 1>} : memref<18x18x128xf32, #tpu.memory_space<vmem>>, vector<8x8x128xf32>
    %35 = vector.shape_cast %34 : vector<8x8x128xf32> to vector<64x128xf32>
    %36 = arith.truncf %35 : vector<64x128xf32> to vector<64x128xbf16>
    %c0_42 = arith.constant 0 : index
    %c512 = arith.constant 512 : index
    %37 = vector.load %arg13[%c0_42, %c512] : memref<64x1152xbf16, #tpu.memory_space<vmem>>, vector<64x128xbf16>
    tpu.vector_store %arg13[%c0_42, %c512], %36 {strides = array<i32>} : memref<64x1152xbf16, #tpu.memory_space<vmem>>, vector<64x128xbf16>,
    %c1_43 = arith.constant 1 : index
    %c2_44 = arith.constant 2 : index
    %c0_45 = arith.constant 0 : index
    %38 = tpu.strided_load %arg12[%c1_43, %c2_44, %c0_45] {strides = array<i32: 2, 2, 1>} : memref<18x18x128xf32, #tpu.memory_space<vmem>>, vector<8x8x128xf32>
    %39 = vector.shape_cast %38 : vector<8x8x128xf32> to vector<64x128xf32>
    %40 = arith.truncf %39 : vector<64x128xf32> to vector<64x128xbf16>
    %c0_46 = arith.constant 0 : index
    %c640 = arith.constant 640 : index
    %41 = vector.load %arg13[%c0_46, %c640] : memref<64x1152xbf16, #tpu.memory_space<vmem>>, vector<64x128xbf16>
    tpu.vector_store %arg13[%c0_46, %c640], %40 {strides = array<i32>} : memref<64x1152xbf16, #tpu.memory_space<vmem>>, vector<64x128xbf16>,
    %c2_47 = arith.constant 2 : index
    %c0_48 = arith.constant 0 : index
    %c0_49 = arith.constant 0 : index
    %42 = tpu.strided_load %arg12[%c2_47, %c0_48, %c0_49] {strides = array<i32: 2, 2, 1>} : memref<18x18x128xf32, #tpu.memory_space<vmem>>, vector<8x8x128xf32>
    %43 = vector.shape_cast %42 : vector<8x8x128xf32> to vector<64x128xf32>
    %44 = arith.truncf %43 : vector<64x128xf32> to vector<64x128xbf16>
    %c0_50 = arith.constant 0 : index
    %c768 = arith.constant 768 : index
    %45 = vector.load %arg13[%c0_50, %c768] : memref<64x1152xbf16, #tpu.memory_space<vmem>>, vector<64x128xbf16>
    tpu.vector_store %arg13[%c0_50, %c768], %44 {strides = array<i32>} : memref<64x1152xbf16, #tpu.memory_space<vmem>>, vector<64x128xbf16>,
    %c2_51 = arith.constant 2 : index
    %c1_52 = arith.constant 1 : index
    %c0_53 = arith.constant 0 : index
    %46 = tpu.strided_load %arg12[%c2_51, %c1_52, %c0_53] {strides = array<i32: 2, 2, 1>} : memref<18x18x128xf32, #tpu.memory_space<vmem>>, vector<8x8x128xf32>
    %47 = vector.shape_cast %46 : vector<8x8x128xf32> to vector<64x128xf32>
    %48 = arith.truncf %47 : vector<64x128xf32> to vector<64x128xbf16>
    %c0_54 = arith.constant 0 : index
    %c896 = arith.constant 896 : index
    %49 = vector.load %arg13[%c0_54, %c896] : memref<64x1152xbf16, #tpu.memory_space<vmem>>, vector<64x128xbf16>
    tpu.vector_store %arg13[%c0_54, %c896], %48 {strides = array<i32>} : memref<64x1152xbf16, #tpu.memory_space<vmem>>, vector<64x128xbf16>,
    %c2_55 = arith.constant 2 : index
    %c2_56 = arith.constant 2 : index
    %c0_57 = arith.constant 0 : index
    %50 = tpu.strided_load %arg12[%c2_55, %c2_56, %c0_57] {strides = array<i32: 2, 2, 1>} : memref<18x18x128xf32, #tpu.memory_space<vmem>>, vector<8x8x128xf32>
    %51 = vector.shape_cast %50 : vector<8x8x128xf32> to vector<64x128xf32>
    %52 = arith.truncf %51 : vector<64x128xf32> to vector<64x128xbf16>
    %c0_58 = arith.constant 0 : index
    %c1024 = arith.constant 1024 : index
    %53 = vector.load %arg13[%c0_58, %c1024] : memref<64x1152xbf16, #tpu.memory_space<vmem>>, vector<64x128xbf16>
    tpu.vector_store %arg13[%c0_58, %c1024], %52 {strides = array<i32>} : memref<64x1152xbf16, #tpu.memory_space<vmem>>, vector<64x128xbf16>,
    %c0_59 = arith.constant 0 : index
    %c0_60 = arith.constant 0 : index
    %54 = vector.load %arg13[%c0_59, %c0_60] : memref<64x1152xbf16, #tpu.memory_space<vmem>>, vector<64x1152xbf16>
    %c0_61 = arith.constant 0 : index
    %c0_62 = arith.constant 0 : index
    %55 = vector.load %arg4[%c0_61, %c0_62] : memref<1152x128xbf16, #tpu.memory_space<vmem>>, vector<1152x128xbf16>
    %cst_63 = arith.constant dense<0.000000e+00> : vector<64x128xf32>
    %56 = tpu.matmul %54, %55, %cst_63 {dimension_numbers = #tpu.dot_dimension_numbers<[1], [0], [0], [1], [0, 0, 1, 1], [], []>} : vector<64x1152xbf16>, vector<1152x128xbf16>, vector<64x128xf32> -> vector<64x128xf32>
    %c0_64 = arith.constant 0 : index
    %c0_65 = arith.constant 0 : index
    %57 = vector.load %arg5[%c0_64, %c0_65] : memref<1x128xf32, #tpu.memory_space<vmem>>, vector<1x128xf32>
    %58 = vector.broadcast %57 : vector<1x128xf32> to vector<64x128xf32>
    %59 = arith.addf %56, %58 : vector<64x128xf32>
    %cst_66 = arith.constant 0.000000e+00 : f32
    %60 = vector.broadcast %cst_66 : f32 to vector<64x128xf32>
    %61 = arith.maximumf %59, %60 : vector<64x128xf32>
    %62 = arith.truncf %61 : vector<64x128xf32> to vector<64x128xbf16>
    %c0_67 = arith.constant 0 : index
    %c0_68 = arith.constant 0 : index
    %63 = vector.load %arg6[%c0_67, %c0_68] : memref<128x64xbf16, #tpu.memory_space<vmem>>, vector<128x64xbf16>
    %cst_69 = arith.constant dense<0.000000e+00> : vector<64x64xf32>
    %64 = tpu.matmul %62, %63, %cst_69 {dimension_numbers = #tpu.dot_dimension_numbers<[1], [0], [0], [1], [0, 0, 1, 1], [], []>} : vector<64x128xbf16>, vector<128x64xbf16>, vector<64x64xf32> -> vector<64x64xf32>
    %c0_70 = arith.constant 0 : index
    %c0_71 = arith.constant 0 : index
    %65 = vector.load %arg7[%c0_70, %c0_71] : memref<1x64xf32, #tpu.memory_space<vmem>>, vector<1x64xf32>
    %66 = vector.broadcast %65 : vector<1x64xf32> to vector<64x64xf32>
    %67 = arith.addf %64, %66 : vector<64x64xf32>
    %c0_72 = arith.constant 0 : index
    %c0_73 = arith.constant 0 : index
    %c0_74 = arith.constant 0 : index
    %c0_75 = arith.constant 0 : index
    %68 = vector.load %arg10[%c0_72, %c0_73, %c0_74, %c0_75] : memref<2x8x8x16xbf16, #tpu.memory_space<vmem>>, vector<1x8x8x16xbf16>
    %69 = vector.shape_cast %68 : vector<1x8x8x16xbf16> to vector<8x8x16xbf16>
    %70 = vector.shape_cast %69 : vector<8x8x16xbf16> to vector<64x16xbf16>
    %c0_76 = arith.constant 0 : index
    %c0_77 = arith.constant 0 : index
    %71 = vector.load %arg8[%c0_76, %c0_77] : memref<16x64xbf16, #tpu.memory_space<vmem>>, vector<16x64xbf16>
    %cst_78 = arith.constant dense<0.000000e+00> : vector<64x64xf32>
    %72 = tpu.matmul %70, %71, %cst_78 {dimension_numbers = #tpu.dot_dimension_numbers<[1], [0], [0], [1], [0, 0, 1, 1], [], []>} : vector<64x16xbf16>, vector<16x64xbf16>, vector<64x64xf32> -> vector<64x64xf32>
    %c0_79 = arith.constant 0 : index
    %c0_80 = arith.constant 0 : index
    %73 = vector.load %arg9[%c0_79, %c0_80] : memref<1x64xf32, #tpu.memory_space<vmem>>, vector<1x64xf32>
    %74 = vector.broadcast %73 : vector<1x64xf32> to vector<64x64xf32>
    %75 = arith.addf %72, %74 : vector<64x64xf32>
    %76 = arith.addf %67, %75 : vector<64x64xf32>
    %cst_81 = arith.constant 0.000000e+00 : f32
    %77 = vector.broadcast %cst_81 : f32 to vector<64x64xf32>
    %78 = arith.maximumf %76, %77 : vector<64x64xf32>
    %79 = vector.shape_cast %78 : vector<64x64xf32> to vector<8x8x64xf32>
    %80 = arith.truncf %79 : vector<8x8x64xf32> to vector<8x8x64xbf16>
    %c0_82 = arith.constant 0 : index
    %c0_83 = arith.constant 0 : index
    %c0_84 = arith.constant 0 : index
    %c0_85 = arith.constant 0 : index
    %81 = vector.load %arg11[%c0_82, %c0_83, %c0_84, %c0_85] : memref<2x8x8x64xbf16, #tpu.memory_space<vmem>>, vector<1x8x8x64xbf16>
    %82 = vector.shape_cast %81 : vector<1x8x8x64xbf16> to vector<8x8x64xbf16>
    %83 = vector.shape_cast %80 : vector<8x8x64xbf16> to vector<1x8x8x64xbf16>
    tpu.vector_store %arg11[%c0_82, %c0_83, %c0_84, %c0_85], %83 {strides = array<i32>} : memref<2x8x8x64xbf16, #tpu.memory_space<vmem>>, vector<1x8x8x64xbf16>,
    %c1_86 = arith.constant 1 : index
    %c0_87 = arith.constant 0 : index
    %c0_88 = arith.constant 0 : index
    %c0_89 = arith.constant 0 : index
    %84 = vector.load %arg1[%c1_86, %c0_87, %c0_88, %c0_89] : memref<2x16x16x16xbf16, #tpu.memory_space<vmem>>, vector<1x16x16x16xbf16>
    %85 = vector.shape_cast %84 : vector<1x16x16x16xbf16> to vector<16x16x16xbf16>
    %86 = vector.shape_cast %85 : vector<16x16x16xbf16> to vector<256x16xbf16>
    %c0_90 = arith.constant 0 : index
    %c0_91 = arith.constant 0 : index
    %87 = vector.load %arg2[%c0_90, %c0_91] : memref<16x128xbf16, #tpu.memory_space<vmem>>, vector<16x128xbf16>
    %cst_92 = arith.constant dense<0.000000e+00> : vector<256x128xf32>
    %88 = tpu.matmul %86, %87, %cst_92 {dimension_numbers = #tpu.dot_dimension_numbers<[1], [0], [0], [1], [0, 0, 1, 1], [], []>} : vector<256x16xbf16>, vector<16x128xbf16>, vector<256x128xf32> -> vector<256x128xf32>
    %c0_93 = arith.constant 0 : index
    %c0_94 = arith.constant 0 : index
    %89 = vector.load %arg3[%c0_93, %c0_94] : memref<1x128xf32, #tpu.memory_space<vmem>>, vector<1x128xf32>
    %90 = vector.broadcast %89 : vector<1x128xf32> to vector<256x128xf32>
    %91 = arith.addf %88, %90 : vector<256x128xf32>
    %cst_95 = arith.constant 0.000000e+00 : f32
    %92 = vector.broadcast %cst_95 : f32 to vector<256x128xf32>
    %93 = arith.maximumf %91, %92 : vector<256x128xf32>
    %94 = vector.shape_cast %93 : vector<256x128xf32> to vector<16x16x128xf32>
    %c1_96 = arith.constant 1 : index
    %c1_97 = arith.constant 1 : index
    %c0_98 = arith.constant 0 : index
    %95 = vector.load %arg12[%c1_96, %c1_97, %c0_98] : memref<18x18x128xf32, #tpu.memory_space<vmem>>, vector<16x16x128xf32>
    tpu.vector_store %arg12[%c1_96, %c1_97, %c0_98], %94 {strides = array<i32>} : memref<18x18x128xf32, #tpu.memory_space<vmem>>, vector<16x16x128xf32>,
    %c0_99 = arith.constant 0 : index
    %c0_100 = arith.constant 0 : index
    %c0_101 = arith.constant 0 : index
    %96 = tpu.strided_load %arg12[%c0_99, %c0_100, %c0_101] {strides = array<i32: 2, 2, 1>} : memref<18x18x128xf32, #tpu.memory_space<vmem>>, vector<8x8x128xf32>
    %97 = vector.shape_cast %96 : vector<8x8x128xf32> to vector<64x128xf32>
    %98 = arith.truncf %97 : vector<64x128xf32> to vector<64x128xbf16>
    %c0_102 = arith.constant 0 : index
    %c0_103 = arith.constant 0 : index
    %99 = vector.load %arg13[%c0_102, %c0_103] : memref<64x1152xbf16, #tpu.memory_space<vmem>>, vector<64x128xbf16>
    tpu.vector_store %arg13[%c0_102, %c0_103], %98 {strides = array<i32>} : memref<64x1152xbf16, #tpu.memory_space<vmem>>, vector<64x128xbf16>,
    %c0_104 = arith.constant 0 : index
    %c1_105 = arith.constant 1 : index
    %c0_106 = arith.constant 0 : index
    %100 = tpu.strided_load %arg12[%c0_104, %c1_105, %c0_106] {strides = array<i32: 2, 2, 1>} : memref<18x18x128xf32, #tpu.memory_space<vmem>>, vector<8x8x128xf32>
    %101 = vector.shape_cast %100 : vector<8x8x128xf32> to vector<64x128xf32>
    %102 = arith.truncf %101 : vector<64x128xf32> to vector<64x128xbf16>
    %c0_107 = arith.constant 0 : index
    %c128_108 = arith.constant 128 : index
    %103 = vector.load %arg13[%c0_107, %c128_108] : memref<64x1152xbf16, #tpu.memory_space<vmem>>, vector<64x128xbf16>
    tpu.vector_store %arg13[%c0_107, %c128_108], %102 {strides = array<i32>} : memref<64x1152xbf16, #tpu.memory_space<vmem>>, vector<64x128xbf16>,
    %c0_109 = arith.constant 0 : index
    %c2_110 = arith.constant 2 : index
    %c0_111 = arith.constant 0 : index
    %104 = tpu.strided_load %arg12[%c0_109, %c2_110, %c0_111] {strides = array<i32: 2, 2, 1>} : memref<18x18x128xf32, #tpu.memory_space<vmem>>, vector<8x8x128xf32>
    %105 = vector.shape_cast %104 : vector<8x8x128xf32> to vector<64x128xf32>
    %106 = arith.truncf %105 : vector<64x128xf32> to vector<64x128xbf16>
    %c0_112 = arith.constant 0 : index
    %c256_113 = arith.constant 256 : index
    %107 = vector.load %arg13[%c0_112, %c256_113] : memref<64x1152xbf16, #tpu.memory_space<vmem>>, vector<64x128xbf16>
    tpu.vector_store %arg13[%c0_112, %c256_113], %106 {strides = array<i32>} : memref<64x1152xbf16, #tpu.memory_space<vmem>>, vector<64x128xbf16>,
    %c1_114 = arith.constant 1 : index
    %c0_115 = arith.constant 0 : index
    %c0_116 = arith.constant 0 : index
    %108 = tpu.strided_load %arg12[%c1_114, %c0_115, %c0_116] {strides = array<i32: 2, 2, 1>} : memref<18x18x128xf32, #tpu.memory_space<vmem>>, vector<8x8x128xf32>
    %109 = vector.shape_cast %108 : vector<8x8x128xf32> to vector<64x128xf32>
    %110 = arith.truncf %109 : vector<64x128xf32> to vector<64x128xbf16>
    %c0_117 = arith.constant 0 : index
    %c384_118 = arith.constant 384 : index
    %111 = vector.load %arg13[%c0_117, %c384_118] : memref<64x1152xbf16, #tpu.memory_space<vmem>>, vector<64x128xbf16>
    tpu.vector_store %arg13[%c0_117, %c384_118], %110 {strides = array<i32>} : memref<64x1152xbf16, #tpu.memory_space<vmem>>, vector<64x128xbf16>,
    %c1_119 = arith.constant 1 : index
    %c1_120 = arith.constant 1 : index
    %c0_121 = arith.constant 0 : index
    %112 = tpu.strided_load %arg12[%c1_119, %c1_120, %c0_121] {strides = array<i32: 2, 2, 1>} : memref<18x18x128xf32, #tpu.memory_space<vmem>>, vector<8x8x128xf32>
    %113 = vector.shape_cast %112 : vector<8x8x128xf32> to vector<64x128xf32>
    %114 = arith.truncf %113 : vector<64x128xf32> to vector<64x128xbf16>
    %c0_122 = arith.constant 0 : index
    %c512_123 = arith.constant 512 : index
    %115 = vector.load %arg13[%c0_122, %c512_123] : memref<64x1152xbf16, #tpu.memory_space<vmem>>, vector<64x128xbf16>
    tpu.vector_store %arg13[%c0_122, %c512_123], %114 {strides = array<i32>} : memref<64x1152xbf16, #tpu.memory_space<vmem>>, vector<64x128xbf16>,
    %c1_124 = arith.constant 1 : index
    %c2_125 = arith.constant 2 : index
    %c0_126 = arith.constant 0 : index
    %116 = tpu.strided_load %arg12[%c1_124, %c2_125, %c0_126] {strides = array<i32: 2, 2, 1>} : memref<18x18x128xf32, #tpu.memory_space<vmem>>, vector<8x8x128xf32>
    %117 = vector.shape_cast %116 : vector<8x8x128xf32> to vector<64x128xf32>
    %118 = arith.truncf %117 : vector<64x128xf32> to vector<64x128xbf16>
    %c0_127 = arith.constant 0 : index
    %c640_128 = arith.constant 640 : index
    %119 = vector.load %arg13[%c0_127, %c640_128] : memref<64x1152xbf16, #tpu.memory_space<vmem>>, vector<64x128xbf16>
    tpu.vector_store %arg13[%c0_127, %c640_128], %118 {strides = array<i32>} : memref<64x1152xbf16, #tpu.memory_space<vmem>>, vector<64x128xbf16>,
    %c2_129 = arith.constant 2 : index
    %c0_130 = arith.constant 0 : index
    %c0_131 = arith.constant 0 : index
    %120 = tpu.strided_load %arg12[%c2_129, %c0_130, %c0_131] {strides = array<i32: 2, 2, 1>} : memref<18x18x128xf32, #tpu.memory_space<vmem>>, vector<8x8x128xf32>
    %121 = vector.shape_cast %120 : vector<8x8x128xf32> to vector<64x128xf32>
    %122 = arith.truncf %121 : vector<64x128xf32> to vector<64x128xbf16>
    %c0_132 = arith.constant 0 : index
    %c768_133 = arith.constant 768 : index
    %123 = vector.load %arg13[%c0_132, %c768_133] : memref<64x1152xbf16, #tpu.memory_space<vmem>>, vector<64x128xbf16>
    tpu.vector_store %arg13[%c0_132, %c768_133], %122 {strides = array<i32>} : memref<64x1152xbf16, #tpu.memory_space<vmem>>, vector<64x128xbf16>,
    %c2_134 = arith.constant 2 : index
    %c1_135 = arith.constant 1 : index
    %c0_136 = arith.constant 0 : index
    %124 = tpu.strided_load %arg12[%c2_134, %c1_135, %c0_136] {strides = array<i32: 2, 2, 1>} : memref<18x18x128xf32, #tpu.memory_space<vmem>>, vector<8x8x128xf32>
    %125 = vector.shape_cast %124 : vector<8x8x128xf32> to vector<64x128xf32>
    %126 = arith.truncf %125 : vector<64x128xf32> to vector<64x128xbf16>
    %c0_137 = arith.constant 0 : index
    %c896_138 = arith.constant 896 : index
    %127 = vector.load %arg13[%c0_137, %c896_138] : memref<64x1152xbf16, #tpu.memory_space<vmem>>, vector<64x128xbf16>
    tpu.vector_store %arg13[%c0_137, %c896_138], %126 {strides = array<i32>} : memref<64x1152xbf16, #tpu.memory_space<vmem>>, vector<64x128xbf16>,
    %c2_139 = arith.constant 2 : index
    %c2_140 = arith.constant 2 : index
    %c0_141 = arith.constant 0 : index
    %128 = tpu.strided_load %arg12[%c2_139, %c2_140, %c0_141] {strides = array<i32: 2, 2, 1>} : memref<18x18x128xf32, #tpu.memory_space<vmem>>, vector<8x8x128xf32>
    %129 = vector.shape_cast %128 : vector<8x8x128xf32> to vector<64x128xf32>
    %130 = arith.truncf %129 : vector<64x128xf32> to vector<64x128xbf16>
    %c0_142 = arith.constant 0 : index
    %c1024_143 = arith.constant 1024 : index
    %131 = vector.load %arg13[%c0_142, %c1024_143] : memref<64x1152xbf16, #tpu.memory_space<vmem>>, vector<64x128xbf16>
    tpu.vector_store %arg13[%c0_142, %c1024_143], %130 {strides = array<i32>} : memref<64x1152xbf16, #tpu.memory_space<vmem>>, vector<64x128xbf16>,
    %c0_144 = arith.constant 0 : index
    %c0_145 = arith.constant 0 : index
    %132 = vector.load %arg13[%c0_144, %c0_145] : memref<64x1152xbf16, #tpu.memory_space<vmem>>, vector<64x1152xbf16>
    %c0_146 = arith.constant 0 : index
    %c0_147 = arith.constant 0 : index
    %133 = vector.load %arg4[%c0_146, %c0_147] : memref<1152x128xbf16, #tpu.memory_space<vmem>>, vector<1152x128xbf16>
    %cst_148 = arith.constant dense<0.000000e+00> : vector<64x128xf32>
    %134 = tpu.matmul %132, %133, %cst_148 {dimension_numbers = #tpu.dot_dimension_numbers<[1], [0], [0], [1], [0, 0, 1, 1], [], []>} : vector<64x1152xbf16>, vector<1152x128xbf16>, vector<64x128xf32> -> vector<64x128xf32>
    %c0_149 = arith.constant 0 : index
    %c0_150 = arith.constant 0 : index
    %135 = vector.load %arg5[%c0_149, %c0_150] : memref<1x128xf32, #tpu.memory_space<vmem>>, vector<1x128xf32>
    %136 = vector.broadcast %135 : vector<1x128xf32> to vector<64x128xf32>
    %137 = arith.addf %134, %136 : vector<64x128xf32>
    %cst_151 = arith.constant 0.000000e+00 : f32
    %138 = vector.broadcast %cst_151 : f32 to vector<64x128xf32>
    %139 = arith.maximumf %137, %138 : vector<64x128xf32>
    %140 = arith.truncf %139 : vector<64x128xf32> to vector<64x128xbf16>
    %c0_152 = arith.constant 0 : index
    %c0_153 = arith.constant 0 : index
    %141 = vector.load %arg6[%c0_152, %c0_153] : memref<128x64xbf16, #tpu.memory_space<vmem>>, vector<128x64xbf16>
    %cst_154 = arith.constant dense<0.000000e+00> : vector<64x64xf32>
    %142 = tpu.matmul %140, %141, %cst_154 {dimension_numbers = #tpu.dot_dimension_numbers<[1], [0], [0], [1], [0, 0, 1, 1], [], []>} : vector<64x128xbf16>, vector<128x64xbf16>, vector<64x64xf32> -> vector<64x64xf32>
    %c0_155 = arith.constant 0 : index
    %c0_156 = arith.constant 0 : index
    %143 = vector.load %arg7[%c0_155, %c0_156] : memref<1x64xf32, #tpu.memory_space<vmem>>, vector<1x64xf32>
    %144 = vector.broadcast %143 : vector<1x64xf32> to vector<64x64xf32>
    %145 = arith.addf %142, %144 : vector<64x64xf32>
    %c1_157 = arith.constant 1 : index
    %c0_158 = arith.constant 0 : index
    %c0_159 = arith.constant 0 : index
    %c0_160 = arith.constant 0 : index
    %146 = vector.load %arg10[%c1_157, %c0_158, %c0_159, %c0_160] : memref<2x8x8x16xbf16, #tpu.memory_space<vmem>>, vector<1x8x8x16xbf16>
    %147 = vector.shape_cast %146 : vector<1x8x8x16xbf16> to vector<8x8x16xbf16>
    %148 = vector.shape_cast %147 : vector<8x8x16xbf16> to vector<64x16xbf16>
    %c0_161 = arith.constant 0 : index
    %c0_162 = arith.constant 0 : index
    %149 = vector.load %arg8[%c0_161, %c0_162] : memref<16x64xbf16, #tpu.memory_space<vmem>>, vector<16x64xbf16>
    %cst_163 = arith.constant dense<0.000000e+00> : vector<64x64xf32>
    %150 = tpu.matmul %148, %149, %cst_163 {dimension_numbers = #tpu.dot_dimension_numbers<[1], [0], [0], [1], [0, 0, 1, 1], [], []>} : vector<64x16xbf16>, vector<16x64xbf16>, vector<64x64xf32> -> vector<64x64xf32>
    %c0_164 = arith.constant 0 : index
    %c0_165 = arith.constant 0 : index
    %151 = vector.load %arg9[%c0_164, %c0_165] : memref<1x64xf32, #tpu.memory_space<vmem>>, vector<1x64xf32>
    %152 = vector.broadcast %151 : vector<1x64xf32> to vector<64x64xf32>
    %153 = arith.addf %150, %152 : vector<64x64xf32>
    %154 = arith.addf %145, %153 : vector<64x64xf32>
    %cst_166 = arith.constant 0.000000e+00 : f32
    %155 = vector.broadcast %cst_166 : f32 to vector<64x64xf32>
    %156 = arith.maximumf %154, %155 : vector<64x64xf32>
    %157 = vector.shape_cast %156 : vector<64x64xf32> to vector<8x8x64xf32>
    %158 = arith.truncf %157 : vector<8x8x64xf32> to vector<8x8x64xbf16>
    %c1_167 = arith.constant 1 : index
    %c0_168 = arith.constant 0 : index
    %c0_169 = arith.constant 0 : index
    %c0_170 = arith.constant 0 : index
    %159 = vector.load %arg11[%c1_167, %c0_168, %c0_169, %c0_170] : memref<2x8x8x64xbf16, #tpu.memory_space<vmem>>, vector<1x8x8x64xbf16>
    %160 = vector.shape_cast %159 : vector<1x8x8x64xbf16> to vector<8x8x64xbf16>
    %161 = vector.shape_cast %158 : vector<8x8x64xbf16> to vector<1x8x8x64xbf16>
    tpu.vector_store %arg11[%c1_167, %c0_168, %c0_169, %c0_170], %161 {strides = array<i32>} : memref<2x8x8x64xbf16, #tpu.memory_space<vmem>>, vector<1x8x8x64xbf16>,
    return
  }
  func.func @transform_0(%arg0: i32) -> (i32, i32, i32, i32) {
    %c0_i32 = arith.constant 0 : i32
    %c0_i32_0 = arith.constant 0 : i32
    %c0_i32_1 = arith.constant 0 : i32
    %c0_i32_2 = arith.constant 0 : i32
    return %arg0, %c0_i32, %c0_i32_0, %c0_i32_1 : i32, i32, i32, i32
  }
  func.func @transform_1(%arg0: i32) -> (i32, i32) {
    %c0_i32 = arith.constant 0 : i32
    %c0_i32_0 = arith.constant 0 : i32
    %c0_i32_1 = arith.constant 0 : i32
    return %c0_i32, %c0_i32_0 : i32, i32
  }
  func.func @transform_2(%arg0: i32) -> (i32, i32) {
    %c0_i32 = arith.constant 0 : i32
    %c0_i32_0 = arith.constant 0 : i32
    %c0_i32_1 = arith.constant 0 : i32
    return %c0_i32, %c0_i32_0 : i32, i32
  }
  func.func @transform_3(%arg0: i32) -> (i32, i32) {
    %c0_i32 = arith.constant 0 : i32
    %c0_i32_0 = arith.constant 0 : i32
    %c0_i32_1 = arith.constant 0 : i32
    return %c0_i32, %c0_i32_0 : i32, i32
  }
  func.func @transform_4(%arg0: i32) -> (i32, i32) {
    %c0_i32 = arith.constant 0 : i32
    %c0_i32_0 = arith.constant 0 : i32
    %c0_i32_1 = arith.constant 0 : i32
    return %c0_i32, %c0_i32_0 : i32, i32
  }
  func.func @transform_5(%arg0: i32) -> (i32, i32) {
    %c0_i32 = arith.constant 0 : i32
    %c0_i32_0 = arith.constant 0 : i32
    %c0_i32_1 = arith.constant 0 : i32
    return %c0_i32, %c0_i32_0 : i32, i32
  }
  func.func @transform_6(%arg0: i32) -> (i32, i32) {
    %c0_i32 = arith.constant 0 : i32
    %c0_i32_0 = arith.constant 0 : i32
    %c0_i32_1 = arith.constant 0 : i32
    return %c0_i32, %c0_i32_0 : i32, i32
  }
  func.func @transform_7(%arg0: i32) -> (i32, i32) {
    %c0_i32 = arith.constant 0 : i32
    %c0_i32_0 = arith.constant 0 : i32
    %c0_i32_1 = arith.constant 0 : i32
    return %c0_i32, %c0_i32_0 : i32, i32
  }
  func.func @transform_8(%arg0: i32) -> (i32, i32) {
    %c0_i32 = arith.constant 0 : i32
    %c0_i32_0 = arith.constant 0 : i32
    %c0_i32_1 = arith.constant 0 : i32
    return %c0_i32, %c0_i32_0 : i32, i32
  }
  func.func @transform_9(%arg0: i32) -> (i32, i32, i32, i32) {
    %c0_i32 = arith.constant 0 : i32
    %c0_i32_0 = arith.constant 0 : i32
    %c0_i32_1 = arith.constant 0 : i32
    %c0_i32_2 = arith.constant 0 : i32
    return %arg0, %c0_i32, %c0_i32_0, %c0_i32_1 : i32, i32, i32, i32
  }
  func.func @transform_10(%arg0: i32) -> (i32, i32, i32, i32) {
    %c0_i32 = arith.constant 0 : i32
    %c0_i32_0 = arith.constant 0 : i32
    %c0_i32_1 = arith.constant 0 : i32
    %c0_i32_2 = arith.constant 0 : i32
    return %arg0, %c0_i32, %c0_i32_0, %c0_i32_1 : i32, i32, i32, i32
  }
}

</mosaic_0001>

<bundles_post_ra>
// kernel: bottleneck_uq_forward.1
= control target key start
LH: loop header
LB: loop body
LE: loop exit
PB: predicated region body
PF: predicated region fallthrough
CT: control target
= control target key end

     0   :  { %vm204_vm0 = vcmask 130048   ;;  %v4960_v37 = vmov 0.0   ;;  %s5918_s0 = inlined_call_operand.vmem [shape: bf16[2,16,16,16], index: 0, kind: input, shape index: {}]   ;;  %s5919_s1 = inlined_call_operand.vmem [shape: bf16[16,128], index: 1, kind: input, shape index: {}]   ;;  %s5920_s2 = inlined_call_operand.vmem [shape: f32[1,128], index: 2, kind: input, shape index: {}]   ;;  %s5921_s3 = inlined_call_operand.vmem [shape: bf16[1152,128], index: 3, kind: input, shape index: {}]   ;;  %s5922_s4 = inlined_call_operand.vmem [shape: f32[1,128], index: 4, kind: input, shape index: {}]   ;;  %s5923_s5 = inlined_call_operand.vmem [shape: bf16[128,64], index: 5, kind: input, shape index: {}]   ;;  %s5924_s6 = inlined_call_operand.vmem [shape: f32[1,64], index: 6, kind: input, shape index: {}]   ;;  %s5925_s7 = inlined_call_operand.vmem [shape: bf16[16,64], index: 7, kind: input, shape index: {}]   ;;  %s5926_s8 = inlined_call_operand.vmem [shape: f32[1,64], index: 8, kind: input, shape index: {}]   ;;  %s5927_s9 = inlined_call_operand.vmem [shape: bf16[2,8,8,16], index: 9, kind: input, shape index: {}]   ;;  %s5928_s10 = inlined_call_operand.hbm [shape: bf16[2,8,8,64], index: 10, kind: output, shape index: {}]  }
   0x1   :  { %v4732_v0 = vld [vmem:[%s5919_s1] sm:$0xff]   ;;  %v4734_v2 = vld [vmem:[%s5918_s0 + $0x8] sm:$0xff]   ;;  %v4737_v5 = vld [vmem:[%s5918_s0 + $0x10] sm:$0xff]   ;;  %37 = vst [vmem:[#allocation2] sm:$0xff] %v4960_v37 }
   0x2   :  { %v4733_v1 = vld [vmem:[%s5918_s0] sm:$0xff]   ;;  %4494 = vmatprep.subr.bf16.mxu0 %v4732_v0  ;;  %4678 = vmatprep.subr.bf16.mxu1 %v4732_v0  ;;  %v4736_v4 = vld [vmem:[%s5918_s0 + $0x48] sm:$0xff]   ;;  %v4739_v6 = vld [vmem:[%s5918_s0 + $0x50] sm:$0xff]   ;;  %38 = vst [vmem:[#allocation2 + $0x8] sm:$0xff] %v4960_v37 }
   0x3   :  { %4495 = vmatpush3.bf16.msra.mxu0 %v4732_v0  ;;  %4496 = vmatprep.mubr.msk.bf16.mxu0 %vm204_vm0, %v4733_v1  ;;  %v4735_v3 = vld [vmem:[%s5918_s0 + $0x40] sm:$0xff]   ;;  %v4738_v7 = vld [vmem:[%s5918_s0 + $0x18] sm:$0xff]   ;;  %v4742_v11 = vld [vmem:[%s5918_s0 + $0x28] sm:$0xff]   ;;  %39 = vst [vmem:[#allocation2 + $0x10] sm:$0x3] %v4960_v37 }
   0x4   :  { %4679 = vmatpush3.bf16.msra.mxu1 %v4732_v0  ;;  %4512 = vmatprep.mubr.msk.bf16.mxu1 %vm204_vm0, %v4735_v3  ;;  %v4740_v8 = vld [vmem:[%s5918_s0 + $0x58] sm:$0xff]   ;;  %v4741_v9 = vld [vmem:[%s5918_s0 + $0x20] sm:$0xff]   ;;  %v4744_v12 = vld [vmem:[%s5918_s0 + $0x68] sm:$0xff]   ;;  %45 = vst [vmem:[#allocation2 + $0x18] sm:$0x1] %v4960_v37 }
   0x5   :  { %v4743_v10 = vld [vmem:[%s5918_s0 + $0x60] sm:$0xff]   ;;  %v4745_v13 = vld [vmem:[%s5918_s0 + $0x30] sm:$0xff]   ;;  %v4751_v17 = vld [vmem:[%s5921_s3 + $0x48] sm:$0xff]   ;;  %46 = vst [vmem:[#allocation2 + $0x30] sm:$0x1] %v4960_v37 }
   0x6   :  { %4497 = vmatmul.mubr.msk.bf16.vlgmr.msra.gmra.mrb[0].mxu0 %vm204_vm0, %v4734_v2  ;;  %v4749_v14 = vld [vmem:[%s5921_s3 + $0x40] sm:$0xff]   ;;  %v4747_v15 = vld [vmem:[%s5918_s0 + $0x70] sm:$0xff]   ;;  %v4752_v18 = vld [vmem:[%s5921_s3 + $0x8] sm:$0xff]   ;;  %47 = vst [vmem:[#allocation2 + $0x48] sm:$0x1] %v4960_v37 }
   0x7   :  { %4513 = vmatmul.mubr.msk.bf16.vlgmr.msra.gmra.mrb[0].mxu1 %vm204_vm0, %v4736_v4  ;;  %4500 = vmatprep.mubr.msk.bf16.mxu0 %vm204_vm0, %v4737_v5  ;;  %v4750_v16 = vld [vmem:[%s5921_s3] sm:$0xff]   ;;  %v4753_v19 = vld [vmem:[%s5921_s3 + $0x50] sm:$0xff]   ;;  %v4746_v22 = vld [vmem:[%s5918_s0 + $0x38] sm:$0xff]   ;;  %48 = vst [vmem:[#allocation2 + $0x60] sm:$0x1] %v4960_v37 }
   0x8   :  { %4516 = vmatprep.mubr.msk.bf16.mxu1 %vm204_vm0, %v4739_v6  ;;  %4099 = vmatprep.subr.bf16.mxu1 %v4749_v14  ;;  %v4754_v20 = vld [vmem:[%s5921_s3 + $0x10] sm:$0xff]   ;;  %v4755_v21 = vld [vmem:[%s5921_s3 + $0x140] sm:$0xff]   ;;  %v4748_v24 = vld [vmem:[%s5918_s0 + $0x78] sm:$0xff]   ;;  %49 = vst [vmem:[#allocation2 + $0x78] sm:$0x1] %v4960_v37 }
   0x9   :  { %4100 = vmatpush3.bf16.msra.mxu1 %v4750_v16  ;;  %v4756_v23 = vld [vmem:[%s5921_s3 + $0x100] sm:$0xff]   ;;  %4179 = vmatprep.subr.bf16.mxu0 %v4755_v21  ;;  %v4757_v25 = vld [vmem:[%s5921_s3 + $0x58] sm:$0xff]   ;;  %v4759_v27 = vld [vmem:[%s5921_s3 + $0x148] sm:$0xff]   ;;  %50 = vst [vmem:[#allocation2 + $0x90] sm:$0x1] %v4960_v37 }
   0xa   :  { %4101 = vmatprep.subr.bf16.mxu1 %v4751_v17  ;;  %4180 = vmatpush3.bf16.msra.mxu0 %v4756_v23  ;;  %v4758_v26 = vld [vmem:[%s5921_s3 + $0x18] sm:$0xff]   ;;  %v4760_v28 = vld [vmem:[%s5921_s3 + $0x108] sm:$0xff]   ;;  %v4761_v29 = vld [vmem:[%s5921_s3 + $0x60] sm:$0xff]   ;;  %51 = vst [vmem:[#allocation2 + $0xa8] sm:$0x1] %v4960_v37 }
   0xb   :  { %4181 = vmatprep.subr.bf16.mxu0 %v4759_v27  ;;  %v4762_v30 = vld [vmem:[%s5921_s3 + $0x20] sm:$0xff]   ;;  %v4763_v31 = vld [vmem:[%s5921_s3 + $0x150] sm:$0xff]   ;;  %v4765_v33 = vld [vmem:[%s5921_s3 + $0x68] sm:$0xff]   ;;  %52 = vst [vmem:[#allocation2 + $0xc0] sm:$0x1] %v4960_v37 }
   0xc   :  { %v4764_v32 = vld [vmem:[%s5921_s3 + $0x110] sm:$0xff]   ;;  %v4766_v34 = vld [vmem:[%s5921_s3 + $0x28] sm:$0xff]   ;;  %v4767_v35 = vld [vmem:[%s5921_s3 + $0x158] sm:$0xff]   ;;  %53 = vst [vmem:[#allocation2 + $0xd8] sm:$0x1] %v4960_v37 }
   0xd   :  { %4102 = vmatpush3.bf16.msra.mxu1 %v4752_v18  ;;  %v4768_v36 = vld [vmem:[%s5921_s3 + $0x118] sm:$0xff]   ;;  %54 = vst [vmem:[#allocation2 + $0xf0] sm:$0x1] %v4960_v37  ;;  %55 = vst [vmem:[#allocation2 + $0x108] sm:$0x1] %v4960_v37  ;;  %v4769_v38 = vld [vmem:[%s5921_s3 + $0x70] sm:$0xff]  }
   0xe   :  { %4501 = vmatmul.mubr.msk.bf16.gmra.mrb[4].mxu0 %vm204_vm0, %v4738_v7  ;;  %4103 = vmatprep.subr.bf16.mxu1 %v4753_v19  ;;  %56 = vst [vmem:[#allocation2 + $0x120] sm:$0x1] %v4960_v37  ;;  %57 = vst [vmem:[#allocation2 + $0x138] sm:$0x1] %v4960_v37  ;;  %v4770_v39 = vld [vmem:[%s5921_s3 + $0x30] sm:$0xff]   ;;  %v4771_v40 = vld [vmem:[%s5921_s3 + $0x160] sm:$0xff]  }
   0xf   :  { %4517 = vmatmul.mubr.msk.bf16.gmra.mrb[4].mxu1 %vm204_vm0, %v4740_v8  ;;  %4504 = vmatprep.mubr.msk.bf16.mxu0 %vm204_vm0, %v4741_v9  ;;  %58 = vst [vmem:[#allocation2 + $0x150] sm:$0x1] %v4960_v37  ;;  %59 = vst [vmem:[#allocation2 + $0x168] sm:$0x1] %v4960_v37  ;;  %v4772_v41 = vld [vmem:[%s5921_s3 + $0x120] sm:$0xff]   ;;  %v4773_v42 = vld [vmem:[%s5921_s3 + $0x78] sm:$0xff]  }
  0x10   :  { %4520 = vmatprep.mubr.msk.bf16.mxu1 %vm204_vm0, %v4743_v10  ;;  %4182 = vmatpush3.bf16.msra.mxu0 %v4760_v28  ;;  %60 = vst [vmem:[#allocation2 + $0x180] sm:$0x1] %v4960_v37  ;;  %v4774_v43 = vld [vmem:[%s5921_s3 + $0x38] sm:$0xff]   ;;  %v4775_v44 = vld [vmem:[%s5921_s3 + $0x168] sm:$0xff]   ;;  %v4777_v46 = vld [vmem:[%s5921_s3 + $0x170] sm:$0xff]  }
  0x11   :  { %4104 = vmatpush3.bf16.msra.mxu1 %v4754_v20  ;;  %4183 = vmatprep.subr.bf16.mxu0 %v4763_v31  ;;  %v4776_v45 = vld [vmem:[%s5921_s3 + $0x128] sm:$0xff]   ;;  %v4778_v47 = vld [vmem:[%s5921_s3 + $0x130] sm:$0xff]   ;;  %v4779_v48 = vld [vmem:[%s5921_s3 + $0x178] sm:$0xff]  }
  0x12   :  { %4105 = vmatprep.subr.bf16.mxu1 %v4757_v25  ;;  %v4780_v49 = vld [vmem:[%s5921_s3 + $0x138] sm:$0xff]   ;;  %v4781_v50 = vld [vmem:[%s5921_s3 + $0xc0] sm:$0xff]  }
  0x13   :  { %v5188_v51 = vld [vmem:[%s5921_s3 + $0x200] sm:$0xff]  }
  0x14   :  { %4184 = vmatpush3.bf16.msra.mxu0 %v4764_v32 }
  0x15   :  { %4106 = vmatpush3.bf16.msra.mxu1 %v4758_v26  ;;  %4185 = vmatprep.subr.bf16.mxu0 %v4767_v35 }
  0x16   :  { %4505 = vmatmul.mubr.msk.bf16.gmra.mrb[8].mxu0 %vm204_vm0, %v4742_v11  ;;  %4107 = vmatprep.subr.bf16.mxu1 %v4761_v29 }
  0x17   :  { %4521 = vmatmul.mubr.msk.bf16.gmra.mrb[8].mxu1 %vm204_vm0, %v4744_v12  ;;  %4508 = vmatprep.mubr.msk.bf16.mxu0 %vm204_vm0, %v4745_v13 }
  0x18   :  { %4524 = vmatprep.mubr.msk.bf16.mxu1 %vm204_vm0, %v4747_v15  ;;  %4186 = vmatpush3.bf16.msra.mxu0 %v4768_v36 }
  0x19   :  { %4108 = vmatpush3.bf16.msra.mxu1 %v4762_v30  ;;  %4187 = vmatprep.subr.bf16.mxu0 %v4771_v40 }
  0x1a   :  { %4109 = vmatprep.subr.bf16.mxu1 %v4765_v33 }
  0x1c   :  { %4188 = vmatpush3.bf16.msra.mxu0 %v4772_v41 }
  0x1d   :  { %4110 = vmatpush3.bf16.msra.mxu1 %v4766_v34  ;;  %4189 = vmatprep.subr.bf16.mxu0 %v4775_v44 }
  0x1e   :  { %4509 = vmatmul.mubr.msk.bf16.gmra.mrb[12].mxu0 %vm204_vm0, %v4746_v22  ;;  %4111 = vmatprep.subr.bf16.mxu1 %v4769_v38 }
  0x1f   :  { %4525 = vmatmul.mubr.msk.bf16.gmra.mrb[12].mxu1 %vm204_vm0, %v4748_v24 }
  0x20   :  { %4190 = vmatpush3.bf16.msra.mxu0 %v4776_v45 }
  0x21   :  { %4112 = vmatpush3.bf16.msra.mxu1 %v4770_v39  ;;  %4191 = vmatprep.subr.bf16.mxu0 %v4777_v46 }
  0x22   :  { %4113 = vmatprep.subr.bf16.mxu1 %v4773_v42 }
  0x24   :  { %4192 = vmatpush3.bf16.msra.mxu0 %v4778_v47 }
  0x25   :  { %4114 = vmatpush3.bf16.msra.mxu1 %v4774_v43  ;;  %4193 = vmatprep.subr.bf16.mxu0 %v4779_v48 }
  0x26   :  { %4139 = vmatprep.subr.bf16.mxu1 %v4781_v50 }
  0x28   :  { %4194 = vmatpush3.bf16.msra.mxu0 %v4780_v49 }
  0x29   :  { %4528 = vmatprep.subr.bf16.mxu0 %v5188_v51 }
  0x2a   :  { %15 = vsyncpa [#allocation5], 0  ;;  %v5194_v52 = vld [vmem:[%s5920_s2] ss:$0 sm:$0xff]  ;;  %v502_v26 = vld [vmem:[#allocation2 + $0x1] ss:$2 sm:$0xff] }
  0x2b   :  { %v478_v32 = vld [vmem:[#allocation2] ss:$2 sm:$0xff]  ;;  %vm1928_vm1 = vcmask 519168  }
  0x2c   :  { %v4782_v43 = vld [vmem:[%s5921_s3 + $0x80] sm:$0xff]   ;;  %v4783_v45 = vld [vmem:[%s5921_s3 + $0xc8] sm:$0xff]  }
  0xd9   :  { %v4498_v53 = vpop.f32.mrb[0].mxu0 }
  0xda   :  { %v296_v54 = vadd.f32 %v4498_v53, %v5194_v52  ;;  %v287_v55 = vpop.f32.mrb[1].mxu0  ;;  %v4514_v56 = vpop.f32.mrb[0].mxu1 }
  0xdb   :  { %v288_v57 = vadd.f32 %v5194_v52, %v287_v55  ;;  %v4499_v58 = vpop.f32.mrb[2].mxu0  ;;  %v360_v59 = vadd.f32 %v4514_v56, %v5194_v52  ;;  %v351_v60 = vpop.f32.mrb[1].mxu1 }
  0xdc   :  { %v416_v61 = vmax.f32 %v296_v54, 0.0  ;;  %v299_v62 = vadd.f32 %v4499_v58, %v5194_v52  ;;  %v290_v63 = vpop.f32.mrb[3].mxu0  ;;  %v352_v0 = vadd.f32 %v5194_v52, %v351_v60  ;;  %v4515_v1 = vpop.f32.mrb[2].mxu1  ;;  %v4784_v60 = vld [vmem:[%s5921_s3 + $0x88] sm:$0xff]  }
  0xdd   :  { %v414_v2 = vmax.f32 %v288_v57, 0.0  ;;  %v291_v3 = vadd.f32 %v5194_v52, %v290_v63  ;;  %v432_v4 = vmax.f32 %v360_v59, 0.0  ;;  %v363_v5 = vadd.f32 %v4515_v1, %v5194_v52  ;;  %v354_v6 = vpop.f32.mrb[3].mxu1 }
  0xde   :  { %448 = vst [vmem:[#allocation2 + $0x31] sm:$0xff] %v416_v61  ;;  %v417_v7 = vmax.f32 %v299_v62, 0.0  ;;  %v430_v8 = vmax.f32 %v352_v0, 0.0  ;;  %v355_v9 = vadd.f32 %v5194_v52, %v354_v6 }
  0xdf   :  { %446 = vst [vmem:[#allocation2 + $0x19] sm:$0xff] %v414_v2  ;;  %v415_v10 = vmax.f32 %v291_v3, 0.0  ;;  %464 = vst [vmem:[#allocation2 + $0xf1] sm:$0xff] %v432_v4  ;;  %v433_v11 = vmax.f32 %v363_v5, 0.0  ;;  %v4785_v2 = vld [vmem:[%s5921_s3 + $0xd0] sm:$0xff]  }
  0xe0   :  { %449 = vst [vmem:[#allocation2 + $0x39] sm:$0xff] %v417_v7  ;;  %462 = vst [vmem:[#allocation2 + $0xd9] sm:$0xff] %v430_v8  ;;  %v431_v12 = vmax.f32 %v355_v9, 0.0 }
  0xe1   :  { %447 = vst [vmem:[#allocation2 + $0x21] sm:$0xff] %v415_v10  ;;  %v4502_v13 = vpop.f32.mrb[4].mxu0  ;;  %465 = vst [vmem:[#allocation2 + $0xf9] sm:$0xff] %v433_v11 }
  0xe2   :  { %v312_v14 = vadd.f32 %v4502_v13, %v5194_v52  ;;  %v303_v15 = vpop.f32.mrb[5].mxu0  ;;  %463 = vst [vmem:[#allocation2 + $0xe1] sm:$0xff] %v431_v12  ;;  %v4518_v16 = vpop.f32.mrb[4].mxu1  ;;  %v4786_v13 = vld [vmem:[%s5921_s3 + $0x90] sm:$0xff]  }
  0xe3   :  { %v304_v17 = vadd.f32 %v5194_v52, %v303_v15  ;;  %v4503_v18 = vpop.f32.mrb[6].mxu0  ;;  %v376_v19 = vadd.f32 %v4518_v16, %v5194_v52  ;;  %v367_v20 = vpop.f32.mrb[5].mxu1 }
  0xe4   :  { %v420_v21 = vmax.f32 %v312_v14, 0.0  ;;  %v315_v22 = vadd.f32 %v4503_v18, %v5194_v52  ;;  %v306_v23 = vpop.f32.mrb[7].mxu0  ;;  %v368_v24 = vadd.f32 %v5194_v52, %v367_v20  ;;  %v4519_v25 = vpop.f32.mrb[6].mxu1 }
  0xe5   :  { %v418_v27 = vmax.f32 %v304_v17, 0.0  ;;  %v307_v28 = vadd.f32 %v5194_v52, %v306_v23  ;;  %v436_v29 = vmax.f32 %v376_v19, 0.0  ;;  %v379_v30 = vadd.f32 %v4519_v25, %v5194_v52  ;;  %v370_v31 = vpop.f32.mrb[7].mxu1  ;;  %v4788_v17 = vld [vmem:[%s5921_s3 + $0xd8] sm:$0xff]  }
  0xe6   :  { %452 = vst [vmem:[#allocation2 + $0x61] sm:$0xff] %v420_v21  ;;  %v421_v33 = vmax.f32 %v315_v22, 0.0  ;;  %v434_v34 = vmax.f32 %v368_v24, 0.0  ;;  %v371_v35 = vadd.f32 %v5194_v52, %v370_v31  ;;  %v4790_v21 = vld [vmem:[%s5921_s3 + $0x208] sm:$0xff]   ;;  %v4789_v31 = vld [vmem:[%s5921_s3 + $0x98] sm:$0xff]  }
  0xe7   :  { %450 = vst [vmem:[#allocation2 + $0x49] sm:$0xff] %v418_v27  ;;  %v419_v36 = vmax.f32 %v307_v28, 0.0  ;;  %468 = vst [vmem:[#allocation2 + $0x121] sm:$0xff] %v436_v29  ;;  %v437_v37 = vmax.f32 %v379_v30, 0.0  ;;  %v504_v38 = vld [vmem:[#allocation2 + $0x31] ss:$2 sm:$0xff] }
  0xe8   :  { %v480_v39 = vld [vmem:[#allocation2 + $0x30] ss:$2 sm:$0xff]  ;;  %453 = vst [vmem:[#allocation2 + $0x69] sm:$0xff] %v421_v33  ;;  %466 = vst [vmem:[#allocation2 + $0x109] sm:$0xff] %v434_v34  ;;  %v435_v40 = vmax.f32 %v371_v35, 0.0  ;;  %v517_v41 = vpack.c.bf16 %v504_v38, %v502_v26 }
  0xe9   :  { %v493_v42 = vpack.c.bf16 %v480_v39, %v478_v32  ;;  %451 = vst [vmem:[#allocation2 + $0x51] sm:$0xff] %v419_v36  ;;  %469 = vst [vmem:[#allocation2 + $0x129] sm:$0xff] %v437_v37  ;;  %v4506_v44 = vpop.f32.mrb[8].mxu0  ;;  %v597_v8 = vld [vmem:[#allocation2 + $0x1a] ss:$2 sm:$0xff]  ;;  %v4793_v38 = vld [vmem:[%s5921_s3 + $0x210] sm:$0xff]  }
  0xea   :  { %v328_v46 = vadd.f32 %v4506_v44, %v5194_v52  ;;  %467 = vst [vmem:[#allocation2 + $0x111] sm:$0xff] %v435_v40  ;;  %v319_v47 = vpop.f32.mrb[9].mxu0  ;;  %1343 = vmatprep.mubr.bf16.mxu1 %v517_v41  ;;  %v4522_v48 = vpop.f32.mrb[8].mxu1  ;;  %v573_v9 = vld [vmem:[#allocation2 + $0x19] ss:$2 sm:$0xff] }
  0xeb   :  { %v320_v49 = vadd.f32 %v5194_v52, %v319_v47  ;;  %v4507_v50 = vpop.f32.mrb[10].mxu0  ;;  %1344 = vmatmul.mubr.bf16.vlgmr.msra.gmra.mrb[16].mxu1 %v493_v42  ;;  %v392_v53 = vadd.f32 %v4522_v48, %v5194_v52  ;;  %v383_v54 = vpop.f32.mrb[9].mxu1  ;;  %v4791_v37 = vld [vmem:[%s5921_s3 + $0xe0] sm:$0xff]  }
  0xec   :  { %v424_v55 = vmax.f32 %v328_v46, 0.0  ;;  %v331_v56 = vadd.f32 %v4507_v50, %v5194_v52  ;;  %v322_v57 = vpop.f32.mrb[11].mxu0  ;;  %v384_v58 = vadd.f32 %v5194_v52, %v383_v54  ;;  %v4523_v59 = vpop.f32.mrb[10].mxu1  ;;  %4140 = vmatpush3.bf16.msra.mxu1 %v4782_v43  ;;  %v4792_v50 = vld [vmem:[%s5921_s3 + $0xa0] sm:$0xff]   ;;  %v4795_v54 = vld [vmem:[%s5921_s3 + $0xa8] sm:$0xff]  }
  0xed   :  { %v422_v61 = vmax.f32 %v320_v49, 0.0  ;;  %v323_v62 = vadd.f32 %v5194_v52, %v322_v57  ;;  %v440_v63 = vmax.f32 %v392_v53, 0.0  ;;  %v395_v0 = vadd.f32 %v4523_v59, %v5194_v52  ;;  %v386_v1 = vpop.f32.mrb[11].mxu1  ;;  %4141 = vmatprep.subr.bf16.mxu1 %v4783_v45  ;;  %v4796_v53 = vld [vmem:[%s5921_s3 + $0x218] sm:$0xff]  }
  0xee   :  { %456 = vst [vmem:[#allocation2 + $0x91] sm:$0xff] %v424_v55  ;;  %v425_v3 = vmax.f32 %v331_v56, 0.0  ;;  %v438_v4 = vmax.f32 %v384_v58, 0.0  ;;  %v387_v5 = vadd.f32 %v5194_v52, %v386_v1  ;;  %v4797_v55 = vld [vmem:[%s5921_s3 + $0xf0] sm:$0xff]   ;;  %v4799_v58 = vld [vmem:[%s5921_s3 + $0x220] sm:$0xff]  }
  0xef   :  { %454 = vst [vmem:[#allocation2 + $0x79] sm:$0xff] %v422_v61  ;;  %v423_v6 = vmax.f32 %v323_v62, 0.0  ;;  %472 = vst [vmem:[#allocation2 + $0x151] sm:$0xff] %v440_v63  ;;  %v441_v7 = vmax.f32 %v395_v0, 0.0  ;;  %v506_v42 = vld [vmem:[#allocation2 + $0x61] ss:$2 sm:$0xff] }
  0xf0   :  { %457 = vst [vmem:[#allocation2 + $0x99] sm:$0xff] %v425_v3  ;;  %470 = vst [vmem:[#allocation2 + $0x139] sm:$0xff] %v438_v4  ;;  %v599_v10 = vld [vmem:[#allocation2 + $0x4a] ss:$2 sm:$0xff]  ;;  %v575_v11 = vld [vmem:[#allocation2 + $0x49] ss:$2 sm:$0xff]  ;;  %4142 = vmatpush3.bf16.msra.mxu1 %v4784_v60 }
  0xf1   :  { %v439_v12 = vmax.f32 %v387_v5, 0.0  ;;  %455 = vst [vmem:[#allocation2 + $0x81] sm:$0xff] %v423_v6  ;;  %v4510_v14 = vpop.f32.mrb[12].mxu0  ;;  %473 = vst [vmem:[#allocation2 + $0x159] sm:$0xff] %v441_v7  ;;  %v612_v15 = vpack.c.bf16 %v599_v10, %v597_v8  ;;  %v588_v16 = vpack.c.bf16 %v575_v11, %v573_v9  ;;  %4143 = vmatprep.subr.bf16.mxu1 %v4785_v2  ;;  %v482_v43 = vld [vmem:[#allocation2 + $0x60] ss:$2 sm:$0xff] }
  0xf2   :  { %v344_v18 = vadd.f32 %v4510_v14, %v5194_v52  ;;  %v335_v19 = vpop.f32.mrb[13].mxu0  ;;  %v4526_v20 = vpop.f32.mrb[12].mxu1  ;;  %v512_v56 = vld [vmem:[#allocation2 + $0xf1] ss:$2 sm:$0xff]  ;;  %v488_v57 = vld [vmem:[#allocation2 + $0xf0] ss:$2 sm:$0xff] }
  0xf3   :  { %471 = vst [vmem:[#allocation2 + $0x141] sm:$0xff] %v439_v12  ;;  %v336_v22 = vadd.f32 %v5194_v52, %v335_v19  ;;  %v4511_v23 = vpop.f32.mrb[14].mxu0  ;;  %1473 = vmatprep.mubr.bf16.mxu0 %v612_v15  ;;  %v408_v24 = vadd.f32 %v4526_v20, %v5194_v52  ;;  %v399_v25 = vpop.f32.mrb[13].mxu1  ;;  %v514_v60 = vld [vmem:[#allocation2 + $0x121] ss:$2 sm:$0xff]  ;;  %v4798_v9 = vld [vmem:[%s5921_s3 + $0xb0] sm:$0xff]  }
  0xf4   :  { %v428_v26 = vmax.f32 %v344_v18, 0.0  ;;  %v347_v27 = vadd.f32 %v4511_v23, %v5194_v52  ;;  %v338_v28 = vpop.f32.mrb[15].mxu0  ;;  %1474 = vmatmul.mubr.bf16.vlgmr.msra.gmra.mrb[16].mxu0 %v588_v16  ;;  %v400_v29 = vadd.f32 %v5194_v52, %v399_v25  ;;  %v4527_v30 = vpop.f32.mrb[14].mxu1  ;;  %4144 = vmatpush3.bf16.msra.mxu1 %v4786_v13  ;;  %v605_v61 = vld [vmem:[#allocation2 + $0xda] ss:$2 sm:$0xff]  ;;  %v4805_v18 = vld [vmem:[%s5921_s3 + $0x230] sm:$0xff]  }
  0xf5   :  { %v426_v32 = vmax.f32 %v336_v22, 0.0  ;;  %v339_v33 = vadd.f32 %v5194_v52, %v338_v28  ;;  %v444_v34 = vmax.f32 %v408_v24, 0.0  ;;  %v411_v35 = vadd.f32 %v4527_v30, %v5194_v52  ;;  %v402_v36 = vpop.f32.mrb[15].mxu1  ;;  %4529 = vmatpush3.bf16.msra.mxu0 %v5188_v51  ;;  %4145 = vmatprep.subr.bf16.mxu1 %v4788_v17  ;;  %v607_v62 = vld [vmem:[#allocation2 + $0x10a] ss:$2 sm:$0xff]  ;;  %v4803_v15 = vld [vmem:[%s5921_s3 + $0x1c0] sm:$0xff]  }
  0xf6   :  { %460 = vst [vmem:[#allocation2 + $0xc1] sm:$0xff] %v428_v26  ;;  %v429_v39 = vmax.f32 %v347_v27, 0.0  ;;  %v442_v40 = vmax.f32 %v400_v29, 0.0  ;;  %v403_v41 = vadd.f32 %v5194_v52, %v402_v36  ;;  %4530 = vmatprep.subr.bf16.mxu0 %v4790_v21  ;;  %v4794_v52 = vld [vmem:[%s5921_s3 + $0xe8] sm:$0xff]   ;;  %v4800_v11 = vld [vmem:[%s5921_s3 + $0xf8] sm:$0xff]   ;;  %v614_v12 = vpack.c.bf16 %v607_v62, %v605_v61 }
  0xf7   :  { %458 = vst [vmem:[#allocation2 + $0xa9] sm:$0xff] %v426_v32  ;;  %v427_v44 = vmax.f32 %v339_v33, 0.0  ;;  %476 = vst [vmem:[#allocation2 + $0x181] sm:$0xff] %v444_v34  ;;  %v445_v51 = vmax.f32 %v411_v35, 0.0  ;;  %v508_v45 = vld [vmem:[#allocation2 + $0x91] ss:$2 sm:$0xff] }
  0xf8   :  { %v484_v46 = vld [vmem:[#allocation2 + $0x90] ss:$2 sm:$0xff]  ;;  %461 = vst [vmem:[#allocation2 + $0xc9] sm:$0xff] %v429_v39  ;;  %474 = vst [vmem:[#allocation2 + $0x169] sm:$0xff] %v442_v40  ;;  %v443_v47 = vmax.f32 %v403_v41, 0.0  ;;  %v518_v48 = vpack.c.bf16 %v508_v45, %v506_v42  ;;  %4146 = vmatpush3.bf16.msra.mxu1 %v4789_v31  ;;  %v4802_v13 = vld [vmem:[%s5921_s3 + $0x228] sm:$0xff]  }
  0xf9   :  { %v494_v49 = vpack.c.bf16 %v484_v46, %v482_v43  ;;  %459 = vst [vmem:[#allocation2 + $0xb1] sm:$0xff] %v427_v44  ;;  %477 = vst [vmem:[#allocation2 + $0x189] sm:$0xff] %v445_v51  ;;  %4531 = vmatpush3.bf16.msra.mxu0 %v4790_v21  ;;  %4147 = vmatprep.subr.bf16.mxu1 %v4791_v37  ;;  %v601_v59 = vld [vmem:[#allocation2 + $0x7a] ss:$2 sm:$0xff]  ;;  %v516_v1 = vld [vmem:[#allocation2 + $0x151] ss:$2 sm:$0xff] }
  0xfa   :  { %475 = vst [vmem:[#allocation2 + $0x171] sm:$0xff] %v443_v47  ;;  %1351 = vmatprep.mubr.bf16.mxu1 %v518_v48  ;;  %4532 = vmatprep.subr.bf16.mxu0 %v4793_v38  ;;  %v577_v5 = vld [vmem:[#allocation2 + $0x79] ss:$2 sm:$0xff]  ;;  %v520_v10 = vpack.c.bf16 %v516_v1, %v514_v60  ;;  %v490_v16 = vld [vmem:[#allocation2 + $0x120] ss:$2 sm:$0xff]  ;;  %v4809_v46 = vld [vmem:[%s5921_s3 + $0x1d0] sm:$0xff]  }
  0xfb   :  { %1352 = vmatmul.mubr.bf16.gmra.mrb[20].mxu1 %v494_v49  ;;  %v4801_v14 = vld [vmem:[%s5921_s3 + $0xb8] sm:$0xff]   ;;  %v551_v19 = vld [vmem:[#allocation2 + $0x48] ss:$2 sm:$0xff]  ;;  %v583_v21 = vld [vmem:[#allocation2 + $0x109] ss:$2 sm:$0xff] }
  0xfc   :  { %4148 = vmatpush3.bf16.msra.mxu1 %v4792_v50  ;;  %v492_v17 = vld [vmem:[#allocation2 + $0x150] ss:$2 sm:$0xff]  ;;  %v581_v20 = vld [vmem:[#allocation2 + $0xd9] ss:$2 sm:$0xff]  ;;  %v4806_v43 = vld [vmem:[%s5921_s3 + $0x1c8] sm:$0xff]  }
  0xfd   :  { %4533 = vmatpush3.bf16.msra.mxu0 %v4793_v38  ;;  %4149 = vmatprep.subr.bf16.mxu1 %v4794_v52  ;;  %v609_v22 = vld [vmem:[#allocation2 + $0x13a] ss:$2 sm:$0xff]  ;;  %v496_v24 = vpack.c.bf16 %v492_v17, %v490_v16  ;;  %v590_v27 = vpack.c.bf16 %v583_v21, %v581_v20  ;;  %v585_v34 = vld [vmem:[#allocation2 + $0x139] ss:$2 sm:$0xff]  ;;  %v4824_v20 = vld [vmem:[%s5918_s0 + $0x90] sm:$0xff]  }
  0xfe   :  { %4534 = vmatprep.subr.bf16.mxu0 %v4796_v53  ;;  %v549_v25 = vld [vmem:[#allocation2 + $0x18] ss:$2 sm:$0xff]  ;;  %v4807_v51 = vld [vmem:[%s5921_s3 + $0x188] sm:$0xff]  }
  0xff   :  { %v510_v63 = vld [vmem:[#allocation2 + $0xc1] ss:$2 sm:$0xff]  ;;  %v486_v0 = vld [vmem:[#allocation2 + $0xc0] ss:$2 sm:$0xff]  ;;  %v564_v26 = vpack.c.bf16 %v551_v19, %v549_v25  ;;  %v4808_v29 = vld [vmem:[%s5921_s3 + $0x238] sm:$0xff]  }
 0x100   :  { %v519_v2 = vpack.c.bf16 %v512_v56, %v510_v63  ;;  %v495_v3 = vpack.c.bf16 %v488_v57, %v486_v0  ;;  %v603_v4 = vld [vmem:[#allocation2 + $0xaa] ss:$2 sm:$0xff]  ;;  %v579_v6 = vld [vmem:[#allocation2 + $0xa9] ss:$2 sm:$0xff]  ;;  %4150 = vmatpush3.bf16.msra.mxu1 %v4795_v54  ;;  %v4817_v32 = vld [vmem:[%s5919_s1] sm:$0xff]  }
 0x101   :  { %v613_v7 = vpack.c.bf16 %v603_v4, %v601_v59  ;;  %v589_v8 = vpack.c.bf16 %v579_v6, %v577_v5  ;;  %4535 = vmatpush3.bf16.msra.mxu0 %v4796_v53  ;;  %4151 = vmatprep.subr.bf16.mxu1 %v4797_v55  ;;  %v611_v23 = vld [vmem:[#allocation2 + $0x16a] ss:$2 sm:$0xff]  ;;  %v587_v35 = vld [vmem:[#allocation2 + $0x169] ss:$2 sm:$0xff]  ;;  %v4804_v39 = vld [vmem:[%s5921_s3 + $0x180] sm:$0xff]  }
 0x102   :  { %1359 = vmatprep.mubr.bf16.mxu1 %v519_v2  ;;  %4536 = vmatprep.subr.bf16.mxu0 %v4799_v58  ;;  %v615_v28 = vpack.c.bf16 %v611_v23, %v609_v22  ;;  %v526_v30 = vld [vmem:[#allocation2 + $0x2] ss:$2 sm:$0xff]  ;;  %v528_v31 = vld [vmem:[#allocation2 + $0x32] ss:$2 sm:$0xff]  ;;  %v591_v41 = vpack.c.bf16 %v587_v35, %v585_v34  ;;  %v645_v19 = vld [vmem:[#allocation2 + $0x31] ss:$2 sm:$0xff] }
 0x103   :  { %1360 = vmatmul.mubr.bf16.gmra.mrb[24].mxu1 %v495_v3  ;;  %1481 = vmatprep.mubr.bf16.mxu0 %v613_v7  ;;  %v555_v33 = vld [vmem:[#allocation2 + $0xa8] ss:$2 sm:$0xff]  ;;  %v541_v37 = vpack.c.bf16 %v528_v31, %v526_v30  ;;  %v553_v38 = vld [vmem:[#allocation2 + $0x78] ss:$2 sm:$0xff]  ;;  %v651_v25 = vld [vmem:[#allocation2 + $0xc1] ss:$2 sm:$0xff] }
 0x104   :  { %1367 = vmatprep.mubr.bf16.mxu1 %v520_v10  ;;  %1482 = vmatmul.mubr.bf16.gmra.mrb[20].mxu0 %v589_v8  ;;  %v671_v36 = vld [vmem:[#allocation2 + $0x62] ss:$2 sm:$0xff]  ;;  %v565_v40 = vpack.c.bf16 %v555_v33, %v553_v38  ;;  %v669_v42 = vld [vmem:[#allocation2 + $0x32] ss:$2 sm:$0xff]  ;;  %v649_v30 = vld [vmem:[#allocation2 + $0x91] ss:$2 sm:$0xff] }
 0x105   :  { %1489 = vmatprep.mubr.bf16.mxu0 %v614_v12  ;;  %4152 = vmatpush3.bf16.msra.mxu1 %v4798_v9  ;;  %v684_v44 = vpack.c.bf16 %v671_v36, %v669_v42  ;;  %v532_v45 = vld [vmem:[#allocation2 + $0x92] ss:$2 sm:$0xff]  ;;  %v675_v49 = vld [vmem:[#allocation2 + $0xc2] ss:$2 sm:$0xff]  ;;  %v661_v31 = vpack.c.bf16 %v651_v25, %v649_v30  ;;  %v653_v33 = vld [vmem:[#allocation2 + $0xf1] ss:$2 sm:$0xff] }
 0x106   :  { %4537 = vmatpush3.bf16.msra.mxu0 %v4799_v58  ;;  %4153 = vmatprep.subr.bf16.mxu1 %v4800_v11  ;;  %v557_v47 = vld [vmem:[#allocation2 + $0xd8] ss:$2 sm:$0xff]  ;;  %v559_v48 = vld [vmem:[#allocation2 + $0x108] ss:$2 sm:$0xff]  ;;  %v655_v34 = vld [vmem:[#allocation2 + $0x121] ss:$2 sm:$0xff] }
 0x107   :  { %4538 = vmatprep.subr.bf16.mxu0 %v4802_v13  ;;  %v530_v50 = vld [vmem:[#allocation2 + $0x62] ss:$2 sm:$0xff]  ;;  %v677_v52 = vld [vmem:[#allocation2 + $0xf2] ss:$2 sm:$0xff]  ;;  %v566_v57 = vpack.c.bf16 %v559_v48, %v557_v47  ;;  %v657_v42 = vld [vmem:[#allocation2 + $0x151] ss:$2 sm:$0xff] }
 0x108   :  { %v679_v53 = vld [vmem:[#allocation2 + $0x122] ss:$2 sm:$0xff]  ;;  %v542_v54 = vpack.c.bf16 %v532_v45, %v530_v50  ;;  %v673_v56 = vld [vmem:[#allocation2 + $0x92] ss:$2 sm:$0xff] }
 0x109   :  { %4154 = vmatpush3.bf16.msra.mxu1 %v4801_v14  ;;  %v4810_v55 = vld [vmem:[%s5921_s3 + $0x190] sm:$0xff]   ;;  %v685_v58 = vpack.c.bf16 %v675_v49, %v673_v56  ;;  %v4811_v59 = vld [vmem:[%s5921_s3 + $0x1d8] sm:$0xff]   ;;  %v686_v60 = vpack.c.bf16 %v679_v53, %v677_v52  ;;  %v4813_v63 = vld [vmem:[%s5921_s3 + $0x1e0] sm:$0xff]  }
 0x10a   :  { %4539 = vmatpush3.bf16.msra.mxu0 %v4802_v13  ;;  %4219 = vmatprep.subr.bf16.mxu1 %v4803_v15  ;;  %v4812_v61 = vld [vmem:[%s5921_s3 + $0x198] sm:$0xff]   ;;  %v534_v62 = vld [vmem:[#allocation2 + $0xc2] ss:$2 sm:$0xff]  ;;  %v647_v15 = vld [vmem:[#allocation2 + $0x61] ss:$2 sm:$0xff] }
 0x10b   :  { %1368 = vmatmul.mubr.bf16.gmra.mrb[28].mxu1 %v496_v24  ;;  %4540 = vmatprep.subr.bf16.mxu0 %v4805_v18  ;;  %v561_v0 = vld [vmem:[#allocation2 + $0x138] ss:$2 sm:$0xff]  ;;  %v563_v1 = vld [vmem:[#allocation2 + $0x168] ss:$2 sm:$0xff]  ;;  %v660_v21 = vpack.c.bf16 %v647_v15, %v645_v19 }
 0x10c   :  { %1408 = vmatprep.mubr.bf16.mxu1 %v564_v26  ;;  %1490 = vmatmul.mubr.bf16.gmra.mrb[24].mxu0 %v590_v27  ;;  %v681_v2 = vld [vmem:[#allocation2 + $0x152] ss:$2 sm:$0xff]  ;;  %v683_v3 = vld [vmem:[#allocation2 + $0x182] ss:$2 sm:$0xff]  ;;  %v567_v8 = vpack.c.bf16 %v563_v1, %v561_v0 }
 0x10d   :  { %1497 = vmatprep.mubr.bf16.mxu0 %v615_v28  ;;  %v536_v4 = vld [vmem:[#allocation2 + $0xf2] ss:$2 sm:$0xff]  ;;  %v687_v9 = vpack.c.bf16 %v683_v3, %v681_v2  ;;  %v4815_v10 = vld [vmem:[%s5921_s3 + $0x1e8] sm:$0xff]  }
 0x10e   :  { %4541 = vmatpush3.bf16.msra.mxu0 %v4805_v18  ;;  %v543_v5 = vpack.c.bf16 %v536_v4, %v534_v62  ;;  %v4814_v6 = vld [vmem:[%s5921_s3 + $0x1a0] sm:$0xff]   ;;  %v4816_v11 = vld [vmem:[%s5921_s3 + $0x1a8] sm:$0xff]   ;;  %v4818_v14 = vld [vmem:[%s5921_s3 + $0x1f0] sm:$0xff]  }
 0x10f   :  { %4542 = vmatprep.subr.bf16.mxu0 %v4808_v29  ;;  %v4819_v7 = vld [vmem:[%s5918_s0 + $0x80] sm:$0xff]   ;;  %v4821_v16 = vld [vmem:[%s5918_s0 + $0x88] sm:$0xff]   ;;  %v4820_v18 = vld [vmem:[%s5921_s3 + $0x1b0] sm:$0xff]  }
 0x110   :  { %v538_v12 = vld [vmem:[#allocation2 + $0x122] ss:$2 sm:$0xff]  ;;  %v540_v13 = vld [vmem:[#allocation2 + $0x152] ss:$2 sm:$0xff] }
 0x111   :  { %v544_v17 = vpack.c.bf16 %v540_v13, %v538_v12  ;;  %v4822_v22 = vld [vmem:[%s5921_s3 + $0x1f8] sm:$0xff]   ;;  %v623_v24 = vld [vmem:[#allocation2 + $0x60] ss:$2 sm:$0xff]  ;;  %v4832_v50 = vld [vmem:[%s5918_s0 + $0xd0] sm:$0xff]  }
 0x112   :  { %4543 = vmatpush3.bf16.msra.mxu0 %v4808_v29  ;;  %v4823_v23 = vld [vmem:[%s5921_s3 + $0x1b8] sm:$0xff]   ;;  %v4826_v28 = vld [vmem:[%s5918_s0 + $0xa0] sm:$0xff]   ;;  %v4827_v35 = vld [vmem:[%s5918_s0 + $0xa8] sm:$0xff]  }
 0x113   :  { %1409 = vmatmul.mubr.bf16.vlgmr.msra.gmra.mrb[32].mxu1 %v541_v37  ;;  %4586 = vmatprep.subr.bf16.mxu0 %v4817_v32  ;;  %v4825_v26 = vld [vmem:[%s5918_s0 + $0x98] sm:$0xff]   ;;  %v4828_v37 = vld [vmem:[%s5918_s0 + $0xb0] sm:$0xff]   ;;  %v635_v48 = vld [vmem:[#allocation2 + $0x180] ss:$2 sm:$0xff] }
 0x114   :  { %1416 = vmatprep.mubr.bf16.mxu1 %v565_v40  ;;  %1498 = vmatmul.mubr.bf16.gmra.mrb[28].mxu0 %v591_v41  ;;  %v621_v27 = vld [vmem:[#allocation2 + $0x30] ss:$2 sm:$0xff]  ;;  %v631_v41 = vld [vmem:[#allocation2 + $0x120] ss:$2 sm:$0xff] }
 0x115   :  { %4220 = vmatpush3.bf16.msra.mxu1 %v4804_v39  ;;  %4544 = vmatprep.mubr.bf16.mxu0 %v684_v44  ;;  %v636_v29 = vpack.c.bf16 %v623_v24, %v621_v27  ;;  %v625_v36 = vld [vmem:[#allocation2 + $0x90] ss:$2 sm:$0xff]  ;;  %v662_v39 = vpack.c.bf16 %v655_v34, %v653_v33  ;;  %v4831_v49 = vld [vmem:[%s5918_s0 + $0xc8] sm:$0xff]   ;;  %v4842_v62 = vld [vmem:[%s5923_s5 + $0x20] sm:$0xff]  }
 0x116   :  { %4221 = vmatprep.subr.bf16.mxu1 %v4806_v43  ;;  %v629_v40 = vld [vmem:[#allocation2 + $0xf0] ss:$2 sm:$0xff]  ;;  %v659_v43 = vld [vmem:[#allocation2 + $0x181] ss:$2 sm:$0xff] }
 0x117   :  { %v4829_v44 = vld [vmem:[%s5918_s0 + $0xb8] sm:$0xff]   ;;  %v638_v45 = vpack.c.bf16 %v631_v41, %v629_v40  ;;  %v4836_v56 = vld [vmem:[%s5918_s0 + $0xf0] sm:$0xff]   ;;  %v4844_v0 = vld [vmem:[%s5921_s3 + $0xc0] sm:$0xff]  }
 0x118   :  { %v633_v47 = vld [vmem:[#allocation2 + $0x150] ss:$2 sm:$0xff]  ;;  %v4845_v1 = vld [vmem:[%s5921_s3 + $0x80] sm:$0xff]   ;;  %v4847_v3 = vld [vmem:[%s5921_s3 + $0xc8] sm:$0xff]  }
 0x119   :  { %4222 = vmatpush3.bf16.msra.mxu1 %v4807_v51  ;;  %v4830_v51 = vld [vmem:[%s5918_s0 + $0xc0] sm:$0xff]   ;;  %v639_v52 = vpack.c.bf16 %v635_v48, %v633_v47  ;;  %v4833_v53 = vld [vmem:[%s5918_s0 + $0xd8] sm:$0xff]   ;;  %v4846_v2 = vld [vmem:[%s5923_s5 + $0x30] sm:$0xff]  }
 0x11a   :  { %4223 = vmatprep.subr.bf16.mxu1 %v4809_v46  ;;  %v663_v46 = vpack.c.bf16 %v659_v43, %v657_v42  ;;  %v4848_v4 = vld [vmem:[%s5921_s3 + $0x88] sm:$0xff]   ;;  %v4855_v12 = vld [vmem:[%s5921_s3 + $0xa0] sm:$0xff]   ;;  %v4859_v15 = vld [vmem:[%s5921_s3 + $0xf0] sm:$0xff]  }
 0x11b   :  { %1417 = vmatmul.mubr.bf16.gmra.mrb[36].mxu1 %v542_v54  ;;  %v4834_v54 = vld [vmem:[%s5918_s0 + $0xe0] sm:$0xff]   ;;  %v4857_v13 = vld [vmem:[%s5921_s3 + $0xe8] sm:$0xff]  }
 0x11c   :  { %1424 = vmatprep.mubr.bf16.mxu1 %v566_v57  ;;  %4545 = vmatmul.mubr.bf16.vlgmr.msra.gmra.mrb[32].mxu0 %v685_v58  ;;  %v4837_v57 = vld [vmem:[%s5918_s0 + $0xf8] sm:$0xff]   ;;  %v4838_v58 = vld [vmem:[%s5923_s5] sm:$0xff]  }
 0x11d   :  { %4224 = vmatpush3.bf16.msra.mxu1 %v4810_v55  ;;  %4548 = vmatprep.mubr.bf16.mxu0 %v686_v60  ;;  %v4835_v55 = vld [vmem:[%s5918_s0 + $0xe8] sm:$0xff]   ;;  %v4840_v60 = vld [vmem:[%s5923_s5 + $0x10] sm:$0xff]   ;;  %v4863_v19 = vld [vmem:[%s5921_s3 + $0x1c0] sm:$0xff]  }
 0x11e   :  { %4225 = vmatprep.subr.bf16.mxu1 %v4811_v59  ;;  %4587 = vmatpush3.bf16.msra.mxu0 %v4817_v32  ;;  %v627_v32 = vld [vmem:[#allocation2 + $0xc0] ss:$2 sm:$0xff] }
 0x11f   :  { %v637_v38 = vpack.c.bf16 %v627_v32, %v625_v36  ;;  %v4839_v59 = vld [vmem:[%s5923_s5 + $0x8] sm:$0xff]   ;;  %4345 = vmatprep.subr.bf16.mxu0 %v4844_v0 }
 0x121   :  { %4226 = vmatpush3.bf16.msra.mxu1 %v4812_v61  ;;  %v4841_v61 = vld [vmem:[%s5923_s5 + $0x18] sm:$0xff]  }
 0x122   :  { %4227 = vmatprep.subr.bf16.mxu1 %v4813_v63  ;;  %v4843_v63 = vld [vmem:[%s5923_s5 + $0x28] sm:$0xff]  }
 0x123   :  { %1425 = vmatmul.mubr.bf16.gmra.mrb[40].mxu1 %v543_v5  ;;  %v4849_v5 = vld [vmem:[%s5923_s5 + $0x38] sm:$0xff]  }
 0x124   :  { %1432 = vmatprep.mubr.bf16.mxu1 %v567_v8  ;;  %4549 = vmatmul.mubr.bf16.gmra.mrb[36].mxu0 %v687_v9  ;;  %v4852_v8 = vld [vmem:[%s5921_s3 + $0xd8] sm:$0xff]  }
 0x125   :  { %4228 = vmatpush3.bf16.msra.mxu1 %v4814_v6  ;;  %4588 = vmatprep.mubr.msk.bf16.mxu0 %vm204_vm0, %v4819_v7  ;;  %v4850_v6 = vld [vmem:[%s5921_s3 + $0xd0] sm:$0xff]   ;;  %v4853_v9 = vld [vmem:[%s5921_s3 + $0x98] sm:$0xff]  }
 0x126   :  { %4229 = vmatprep.subr.bf16.mxu1 %v4815_v10  ;;  %v4851_v7 = vld [vmem:[%s5921_s3 + $0x90] sm:$0xff]   ;;  %v4854_v10 = vld [vmem:[%s5921_s3 + $0xe0] sm:$0xff]  }
 0x129   :  { %4230 = vmatpush3.bf16.msra.mxu1 %v4816_v11  ;;  %v5464_v11 = vld [vmem:[%s5925_s7] sm:$0xff]  }
 0x12a   :  { %4231 = vmatprep.subr.bf16.mxu1 %v4818_v14  ;;  %v4858_v14 = vld [vmem:[%s5921_s3 + $0xa8] sm:$0xff]  }
 0x12b   :  { %1433 = vmatmul.mubr.bf16.gmra.mrb[44].mxu1 %v544_v17  ;;  %v4861_v17 = vld [vmem:[%s5921_s3 + $0xf8] sm:$0xff]  }
 0x12c   :  { %1538 = vmatprep.mubr.bf16.mxu1 %v660_v21  ;;  %4589 = vmatmul.mubr.msk.bf16.vlgmr.msra.gmra.mrb[40].mxu0 %vm204_vm0, %v4821_v16  ;;  %v4860_v16 = vld [vmem:[%s5921_s3 + $0xb0] sm:$0xff]  }
 0x12d   :  { %4232 = vmatpush3.bf16.msra.mxu1 %v4820_v18  ;;  %4592 = vmatprep.mubr.msk.bf16.mxu0 %vm204_vm0, %v4824_v20  ;;  %v4862_v18 = vld [vmem:[%s5921_s3 + $0xb8] sm:$0xff]  }
 0x12e   :  { %4233 = vmatprep.subr.bf16.mxu1 %v4822_v22  ;;  %4346 = vmatpush3.bf16.msra.mxu0 %v4845_v1 }
 0x12f   :  { %4347 = vmatprep.subr.bf16.mxu0 %v4847_v3 }
 0x131   :  { %4234 = vmatpush3.bf16.msra.mxu1 %v4823_v23 }
 0x132   :  { %4552 = vmatprep.subr.bf16.mxu1 %v4838_v58  ;;  %4348 = vmatpush3.bf16.msra.mxu0 %v4848_v4 }
 0x133   :  { %4349 = vmatprep.subr.bf16.mxu0 %v4850_v6 }
 0x134   :  { %1539 = vmatmul.mubr.bf16.vlgmr.msra.gmra.mrb[48].mxu1 %v636_v29  ;;  %4593 = vmatmul.mubr.msk.bf16.gmra.mrb[44].mxu0 %vm204_vm0, %v4825_v26 }
 0x135   :  { %1546 = vmatprep.mubr.bf16.mxu1 %v661_v31  ;;  %4596 = vmatprep.mubr.msk.bf16.mxu0 %vm204_vm0, %v4826_v28 }
 0x136   :  { %4553 = vmatpush3.bf16.msra.mxu1 %v4838_v58  ;;  %4350 = vmatpush3.bf16.msra.mxu0 %v4851_v7 }
 0x137   :  { %4554 = vmatprep.subr.bf16.mxu1 %v4839_v59  ;;  %4351 = vmatprep.subr.bf16.mxu0 %v4852_v8 }
 0x13a   :  { %4555 = vmatpush3.bf16.msra.mxu1 %v4839_v59  ;;  %4352 = vmatpush3.bf16.msra.mxu0 %v4853_v9 }
 0x13b   :  { %4556 = vmatprep.subr.bf16.mxu1 %v4840_v60  ;;  %4353 = vmatprep.subr.bf16.mxu0 %v4854_v10 }
 0x13c   :  { %1547 = vmatmul.mubr.bf16.gmra.mrb[52].mxu1 %v637_v38  ;;  %4597 = vmatmul.mubr.msk.bf16.gmra.mrb[48].mxu0 %vm204_vm0, %v4827_v35 }
 0x13d   :  { %1554 = vmatprep.mubr.bf16.mxu1 %v662_v39  ;;  %4600 = vmatprep.mubr.msk.bf16.mxu0 %vm204_vm0, %v4828_v37 }
 0x13e   :  { %4557 = vmatpush3.bf16.msra.mxu1 %v4840_v60  ;;  %4354 = vmatpush3.bf16.msra.mxu0 %v4855_v12 }
 0x13f   :  { %4558 = vmatprep.subr.bf16.mxu1 %v4841_v61  ;;  %4355 = vmatprep.subr.bf16.mxu0 %v4857_v13 }
 0x142   :  { %4559 = vmatpush3.bf16.msra.mxu1 %v4841_v61  ;;  %4356 = vmatpush3.bf16.msra.mxu0 %v4858_v14 }
 0x143   :  { %4560 = vmatprep.subr.bf16.mxu1 %v4842_v62  ;;  %4357 = vmatprep.subr.bf16.mxu0 %v4859_v15 }
 0x144   :  { %1555 = vmatmul.mubr.bf16.gmra.mrb[56].mxu1 %v638_v45  ;;  %4601 = vmatmul.mubr.msk.bf16.gmra.mrb[52].mxu0 %vm204_vm0, %v4829_v44 }
 0x145   :  { %1562 = vmatprep.mubr.bf16.mxu1 %v663_v46  ;;  %4604 = vmatprep.mubr.msk.bf16.mxu0 %vm204_vm0, %v4830_v51 }
 0x146   :  { %4561 = vmatpush3.bf16.msra.mxu1 %v4842_v62  ;;  %4358 = vmatpush3.bf16.msra.mxu0 %v4860_v16  ;;  %v3824_v62 = vld [vmem:[%s5922_s4] ss:$0 sm:$0xff] }
 0x147   :  { %4562 = vmatprep.subr.bf16.mxu1 %v4843_v63  ;;  %4359 = vmatprep.subr.bf16.mxu0 %v4861_v17 }
 0x14a   :  { %4563 = vmatpush3.bf16.msra.mxu1 %v4843_v63  ;;  %4360 = vmatpush3.bf16.msra.mxu0 %v4862_v18 }
 0x14b   :  { %4564 = vmatprep.subr.bf16.mxu1 %v4846_v2  ;;  %4425 = vmatprep.subr.bf16.mxu0 %v4863_v19 }
 0x14c   :  { %1563 = vmatmul.mubr.bf16.gmra.mrb[60].mxu1 %v639_v52  ;;  %4605 = vmatmul.mubr.msk.bf16.gmra.mrb[56].mxu0 %vm204_vm0, %v4831_v49 }
 0x14d   :  { %4608 = vmatprep.mubr.msk.bf16.mxu0 %vm204_vm0, %v4832_v50 }
 0x14e   :  { %4565 = vmatpush3.bf16.msra.mxu1 %v4846_v2 }
 0x14f   :  { %4566 = vmatprep.subr.bf16.mxu1 %v4849_v5 }
 0x152   :  { %4567 = vmatpush3.bf16.msra.mxu1 %v4849_v5 }
 0x153   :  { %4576 = vmatprep.subr.bf16.mxu1 %v5464_v11 }
 0x154   :  { %4609 = vmatmul.mubr.msk.bf16.gmra.mrb[60].mxu0 %vm204_vm0, %v4833_v53 }
 0x155   :  { %4612 = vmatprep.mubr.msk.bf16.mxu0 %vm204_vm0, %v4834_v54 }
 0x15c   :  { %4613 = vmatmul.mubr.msk.bf16.gmra.mrb[64].mxu0 %vm204_vm0, %v4835_v55 }
 0x15d   :  { %4616 = vmatprep.mubr.msk.bf16.mxu0 %vm204_vm0, %v4836_v56 }
 0x164   :  { %4617 = vmatmul.mubr.msk.bf16.gmra.mrb[68].mxu0 %vm204_vm0, %v4837_v57 }
 0x1be   :  { %v4115_v20 = vpop.f32.mrb[16].mxu1 }
 0x1bf   :  { %v4116_v21 = vpop.f32.mrb[17].mxu1 }
 0x1c0   :  { %v4117_v22 = vadd.f32 %v4116_v21, %v4115_v20  ;;  %v4118_v23 = vpop.f32.mrb[18].mxu1 }
 0x1c1   :  { %v4119_v24 = vpop.f32.mrb[19].mxu1 }
 0x1c2   :  { %v4120_v25 = vadd.f32 %v4119_v24, %v4118_v23  ;;  %v1346_v2 = vadd.f32 %v4117_v22, %v3824_v62 }
 0x1c4   :  { %v1349_v9 = vadd.f32 %v4120_v25, %v3824_v62 }
 0x1c7   :  { %v4195_v26 = vpop.f32.mrb[16].mxu0 }
 0x1c8   :  { %v4196_v27 = vpop.f32.mrb[17].mxu0 }
 0x1c9   :  { %v4197_v28 = vadd.f32 %v4196_v27, %v4195_v26  ;;  %v4198_v29 = vpop.f32.mrb[18].mxu0 }
 0x1ca   :  { %v4199_v30 = vpop.f32.mrb[19].mxu0 }
 0x1cb   :  { %v4200_v31 = vadd.f32 %v4199_v30, %v4198_v29 }
 0x1ce   :  { %v4121_v32 = vpop.f32.mrb[20].mxu1 }
 0x1cf   :  { %v4122_v33 = vpop.f32.mrb[21].mxu1 }
 0x1d0   :  { %v4123_v34 = vadd.f32 %v4122_v33, %v4121_v32  ;;  %v4124_v35 = vpop.f32.mrb[22].mxu1 }
 0x1d1   :  { %v4125_v36 = vpop.f32.mrb[23].mxu1 }
 0x1d2   :  { %v4126_v37 = vadd.f32 %v4125_v36, %v4124_v35  ;;  %v1354_v21 = vadd.f32 %v4123_v34, %v3824_v62 }
 0x1d4   :  { %v1357_v27 = vadd.f32 %v4126_v37, %v3824_v62 }
 0x1d6   :  { %v4127_v38 = vpop.f32.mrb[24].mxu1 }
 0x1d7   :  { %v4128_v39 = vpop.f32.mrb[25].mxu1  ;;  %v4201_v40 = vpop.f32.mrb[20].mxu0 }
 0x1d8   :  { %v4129_v41 = vadd.f32 %v4128_v39, %v4127_v38  ;;  %v4130_v42 = vpop.f32.mrb[26].mxu1  ;;  %v4202_v43 = vpop.f32.mrb[21].mxu0 }
 0x1d9   :  { %v4203_v44 = vadd.f32 %v4202_v43, %v4201_v40  ;;  %v4131_v51 = vpop.f32.mrb[27].mxu1  ;;  %v4204_v45 = vpop.f32.mrb[22].mxu0 }
 0x1da   :  { %v4132_v46 = vadd.f32 %v4131_v51, %v4130_v42  ;;  %v4205_v47 = vpop.f32.mrb[23].mxu0  ;;  %v1362_v38 = vadd.f32 %v4129_v41, %v3824_v62 }
 0x1db   :  { %v4206_v48 = vadd.f32 %v4205_v47, %v4204_v45 }
 0x1dc   :  { %v1365_v51 = vadd.f32 %v4132_v46, %v3824_v62 }
 0x1de   :  { %v4133_v49 = vpop.f32.mrb[28].mxu1 }
 0x1df   :  { %v4134_v50 = vpop.f32.mrb[29].mxu1  ;;  %v4207_v52 = vpop.f32.mrb[24].mxu0 }
 0x1e0   :  { %v5491_v53 = vadd.f32 %v4134_v50, %v4133_v49  ;;  %v4136_v54 = vpop.f32.mrb[30].mxu1  ;;  %v4208_v55 = vpop.f32.mrb[25].mxu0 }
 0x1e1   :  { %v4209_v56 = vadd.f32 %v4208_v55, %v4207_v52  ;;  %v4137_v57 = vpop.f32.mrb[31].mxu1  ;;  %v4210_v58 = vpop.f32.mrb[26].mxu0 }
 0x1e2   :  { %v5493_v59 = vadd.f32 %v4137_v57, %v4136_v54  ;;  %v4211_v60 = vpop.f32.mrb[27].mxu0  ;;  %v1370_v57 = vadd.f32 %v5491_v53, %v3824_v62 }
 0x1e3   :  { %v4212_v61 = vadd.f32 %v4211_v60, %v4210_v58 }
 0x1e6   :  { %v4155_v63 = vpop.f32.mrb[32].mxu1 }
 0x1e7   :  { %v4156_v0 = vpop.f32.mrb[33].mxu1  ;;  %v4213_v1 = vpop.f32.mrb[28].mxu0 }
 0x1e8   :  { %v4157_v3 = vadd.f32 %v4156_v0, %v4155_v63  ;;  %v4158_v4 = vpop.f32.mrb[34].mxu1  ;;  %v4214_v5 = vpop.f32.mrb[29].mxu0 }
 0x1e9   :  { %v5498_v6 = vadd.f32 %v4214_v5, %v4213_v1  ;;  %v4159_v7 = vpop.f32.mrb[35].mxu1  ;;  %v4216_v8 = vpop.f32.mrb[30].mxu0 }
 0x1ea   :  { %v1411_v10 = vadd.f32 %v4157_v3, %v1346_v2  ;;  %v4160_v12 = vadd.f32 %v4159_v7, %v4158_v4  ;;  %v4217_v13 = vpop.f32.mrb[31].mxu0 }
 0x1eb   :  { %v5500_v14 = vadd.f32 %v4217_v13, %v4216_v8 }
 0x1ec   :  { %v1414_v15 = vadd.f32 %v4160_v12, %v1349_v9  ;;  %v5502_v16 = vadd.f32 %v4197_v28, %v1411_v10 }
 0x1ee   :  { %v4161_v17 = vpop.f32.mrb[36].mxu1  ;;  %v5504_v18 = vadd.f32 %v4200_v31, %v1414_v15 }
 0x1ef   :  { %v4162_v19 = vpop.f32.mrb[37].mxu1  ;;  %v5506_v20 = vpop.f32.mrb[32].mxu0 }
 0x1f0   :  { %v4163_v22 = vadd.f32 %v4162_v19, %v4161_v17  ;;  %v4164_v23 = vpop.f32.mrb[38].mxu1  ;;  %v5508_v24 = vpop.f32.mrb[33].mxu0 }
 0x1f1   :  { %v4165_v25 = vpop.f32.mrb[39].mxu1  ;;  %v5510_v26 = vpop.f32.mrb[34].mxu0 }
 0x1f2   :  { %v1419_v29 = vadd.f32 %v4163_v22, %v1354_v21  ;;  %v4166_v30 = vadd.f32 %v4165_v25, %v4164_v23  ;;  %v5512_v32 = vpop.f32.mrb[35].mxu0 }
 0x1f4   :  { %v1422_v28 = vadd.f32 %v4166_v30, %v1357_v27  ;;  %v5514_v33 = vadd.f32 %v4203_v44, %v1419_v29 }
 0x1f6   :  { %v4167_v31 = vpop.f32.mrb[40].mxu1  ;;  %v5516_v35 = vadd.f32 %v4206_v48, %v1422_v28  ;;  %v5531_v48 = vld [vmem:[%s5920_s2] ss:$0 sm:$0xff] }
 0x1f7   :  { %v4168_v36 = vpop.f32.mrb[41].mxu1  ;;  %v5518_v34 = vpop.f32.mrb[36].mxu0 }
 0x1f8   :  { %v4169_v39 = vadd.f32 %v4168_v36, %v4167_v31  ;;  %v4170_v40 = vpop.f32.mrb[42].mxu1  ;;  %v5520_v42 = vpop.f32.mrb[37].mxu0 }
 0x1f9   :  { %v4171_v43 = vpop.f32.mrb[43].mxu1  ;;  %v5522_v37 = vpop.f32.mrb[38].mxu0 }
 0x1fa   :  { %v1427_v45 = vadd.f32 %v4169_v39, %v1362_v38  ;;  %v4172_v47 = vadd.f32 %v4171_v43, %v4170_v40  ;;  %v5524_v49 = vpop.f32.mrb[39].mxu0 }
 0x1fc   :  { %v1430_v44 = vadd.f32 %v4172_v47, %v1365_v51  ;;  %v5526_v50 = vadd.f32 %v4209_v56, %v1427_v45  ;;  %v1373_v56 = vadd.f32 %v5493_v59, %v3824_v62 }
 0x1fe   :  { %v4173_v41 = vpop.f32.mrb[44].mxu1  ;;  %v5533_v52 = vadd.f32 %v4212_v61, %v1430_v44 }
 0x1ff   :  { %v4174_v54 = vpop.f32.mrb[45].mxu1  ;;  %v4590_v55 = vpop.f32.mrb[40].mxu0 }
 0x200   :  { %v4175_v46 = vadd.f32 %v4174_v54, %v4173_v41  ;;  %v4176_v58 = vpop.f32.mrb[46].mxu1  ;;  %v2156_v60 = vadd.f32 %v4590_v55, %v5531_v48  ;;  %v2147_v63 = vpop.f32.mrb[41].mxu0 }
 0x201   :  { %v4177_v0 = vpop.f32.mrb[47].mxu1  ;;  %v2148_v1 = vadd.f32 %v5531_v48, %v2147_v63  ;;  %v4591_v2 = vpop.f32.mrb[42].mxu0 }
 0x202   :  { %v1435_v3 = vadd.f32 %v4175_v46, %v1370_v57  ;;  %v4178_v4 = vadd.f32 %v4177_v0, %v4176_v58  ;;  %v2276_v5 = vmax.f32 %v2156_v60, 0.0  ;;  %v2159_v61 = vadd.f32 %v4591_v2, %v5531_v48  ;;  %v2150_v7 = vpop.f32.mrb[43].mxu0 }
 0x203   :  { %v2274_v8 = vmax.f32 %v2148_v1, 0.0  ;;  %v2151_v53 = vadd.f32 %v5531_v48, %v2150_v7 }
 0x204   :  { %v1438_v9 = vadd.f32 %v4178_v4, %v1373_v56  ;;  %2308 = vst [vmem:[#allocation2 + $0x31] sm:$0xff] %v2276_v5  ;;  %v2277_v10 = vmax.f32 %v2159_v61, 0.0  ;;  %v5542_v12 = vadd.f32 %v5498_v6, %v1435_v3  ;;  %v2370_v4 = vld [vmem:[#allocation2 + $0x2] ss:$2 sm:$0xff] }
 0x205   :  { %2306 = vst [vmem:[#allocation2 + $0x19] sm:$0xff] %v2274_v8  ;;  %v2275_v59 = vmax.f32 %v2151_v53, 0.0 }
 0x206   :  { %2309 = vst [vmem:[#allocation2 + $0x39] sm:$0xff] %v2277_v10  ;;  %v5545_v62 = vadd.f32 %v5500_v14, %v1438_v9 }
 0x207   :  { %v4235_v13 = vpop.f32.mrb[48].mxu1  ;;  %2307 = vst [vmem:[#allocation2 + $0x21] sm:$0xff] %v2275_v59  ;;  %v4594_v15 = vpop.f32.mrb[44].mxu0 }
 0x208   :  { %v4236_v17 = vpop.f32.mrb[49].mxu1  ;;  %v2172_v19 = vadd.f32 %v4594_v15, %v5531_v48  ;;  %v2163_v21 = vpop.f32.mrb[45].mxu0 }
 0x209   :  { %v4237_v22 = vadd.f32 %v4236_v17, %v4235_v13  ;;  %v4238_v23 = vpop.f32.mrb[50].mxu1  ;;  %v2164_v25 = vadd.f32 %v5531_v48, %v2163_v21  ;;  %v4595_v27 = vpop.f32.mrb[46].mxu0  ;;  %v4866_v21 = vld [vmem:[%s5921_s3 + $0x180] sm:$0xff]  }
 0x20a   :  { %v4239_v6 = vpop.f32.mrb[51].mxu1  ;;  %v2280_v29 = vmax.f32 %v2172_v19, 0.0  ;;  %v2175_v30 = vadd.f32 %v4595_v27, %v5531_v48  ;;  %v2166_v28 = vpop.f32.mrb[47].mxu0 }
 0x20b   :  { %v1541_v14 = vadd.f32 %v4237_v22, %v5502_v16  ;;  %v4240_v31 = vadd.f32 %v4239_v6, %v4238_v23  ;;  %v2278_v36 = vmax.f32 %v2164_v25, 0.0  ;;  %v2167_v38 = vadd.f32 %v5531_v48, %v2166_v28  ;;  %v4869_v23 = vld [vmem:[%s5921_s3 + $0x1c8] sm:$0xff]  }
 0x20c   :  { %2312 = vst [vmem:[#allocation2 + $0x61] sm:$0xff] %v2280_v29  ;;  %v2281_v39 = vmax.f32 %v2175_v30, 0.0 }
 0x20d   :  { %v1606_v40 = vadd.f32 %v5508_v24, %v1541_v14  ;;  %v1544_v43 = vadd.f32 %v4240_v31, %v5504_v18  ;;  %2310 = vst [vmem:[#allocation2 + $0x49] sm:$0xff] %v2278_v36  ;;  %v2279_v51 = vmax.f32 %v2167_v38, 0.0  ;;  %v2371_v5 = vld [vmem:[#allocation2 + $0x32] ss:$2 sm:$0xff] }
 0x20e   :  { %2313 = vst [vmem:[#allocation2 + $0x69] sm:$0xff] %v2281_v39  ;;  %v2386_v8 = vld [vmem:[#allocation2 + $0x18] ss:$2 sm:$0xff] }
 0x20f   :  { %v1609_v45 = vadd.f32 %v5512_v32, %v1544_v43  ;;  %v4241_v47 = vpop.f32.mrb[52].mxu1  ;;  %2311 = vst [vmem:[#allocation2 + $0x51] sm:$0xff] %v2279_v51  ;;  %v4598_v44 = vpop.f32.mrb[48].mxu0  ;;  %v1636_v55 = vmax.f32 %v1606_v40, 0.0  ;;  %v4865_v51 = vld [vmem:[%s5921_s3 + $0x40] sm:$0xff]  }
 0x210   :  { %v4242_v41 = vpop.f32.mrb[53].mxu1  ;;  %v2188_v16 = vadd.f32 %v4598_v44, %v5531_v48  ;;  %v2179_v54 = vpop.f32.mrb[49].mxu0 }
 0x211   :  { %v1637_v57 = vmax.f32 %v1609_v45, 0.0  ;;  %v4243_v46 = vadd.f32 %v4242_v41, %v4241_v47  ;;  %v4244_v58 = vpop.f32.mrb[54].mxu1  ;;  %v2180_v24 = vadd.f32 %v5531_v48, %v2179_v54  ;;  %v4599_v60 = vpop.f32.mrb[50].mxu0  ;;  %v4871_v45 = vld [vmem:[%s5921_s3 + $0x188] sm:$0xff]  }
 0x212   :  { %v4245_v18 = vpop.f32.mrb[55].mxu1  ;;  %v2284_v63 = vmax.f32 %v2188_v16, 0.0  ;;  %v2191_v56 = vadd.f32 %v4599_v60, %v5531_v48  ;;  %v2182_v0 = vpop.f32.mrb[51].mxu0 }
 0x213   :  { %v1549_v32 = vadd.f32 %v4243_v46, %v5514_v33  ;;  %v4246_v1 = vadd.f32 %v4245_v18, %v4244_v58  ;;  %v1644_v2 = vpack.c.bf16 %v1637_v57, %v1636_v55  ;;  %v2282_v3 = vmax.f32 %v2180_v24, 0.0  ;;  %v4876_v58 = vld [vmem:[%s5921_s3 + $0x190] sm:$0xff]  }
 0x214   :  { %2316 = vst [vmem:[#allocation2 + $0x91] sm:$0xff] %v2284_v63  ;;  %v2285_v61 = vmax.f32 %v2191_v56, 0.0  ;;  %v2183_v7 = vadd.f32 %v5531_v48, %v2182_v0  ;;  %v2378_v33 = vpack.c.bf16 %v2371_v5, %v2370_v4 }
 0x215   :  { %v1614_v53 = vadd.f32 %v5506_v20, %v1549_v32  ;;  %v1552_v9 = vadd.f32 %v4246_v1, %v5516_v35  ;;  %4568 = vmatprep.mubr.bf16.mxu1 %v1644_v2  ;;  %2314 = vst [vmem:[#allocation2 + $0x79] sm:$0xff] %v2282_v3 }
 0x216   :  { %2317 = vst [vmem:[#allocation2 + $0x99] sm:$0xff] %v2285_v61  ;;  %v2283_v10 = vmax.f32 %v2183_v7, 0.0  ;;  %v2387_v59 = vld [vmem:[#allocation2 + $0x48] ss:$2 sm:$0xff] }
 0x217   :  { %v1617_v13 = vadd.f32 %v5510_v26, %v1552_v9  ;;  %v4247_v15 = vpop.f32.mrb[56].mxu1  ;;  %v4602_v17 = vpop.f32.mrb[52].mxu0  ;;  %v2394_v19 = vpack.c.bf16 %v2387_v59, %v2386_v8  ;;  %v1638_v25 = vmax.f32 %v1614_v53, 0.0  ;;  %v4881_v8 = vld [vmem:[%s5921_s3 + $0x198] sm:$0xff]  }
 0x218   :  { %v4248_v22 = vpop.f32.mrb[57].mxu1  ;;  %2315 = vst [vmem:[#allocation2 + $0x81] sm:$0xff] %v2283_v10  ;;  %v2204_v20 = vadd.f32 %v4602_v17, %v5531_v48  ;;  %v2195_v35 = vpop.f32.mrb[53].mxu0  ;;  %v2372_v10 = vld [vmem:[#allocation2 + $0x62] ss:$2 sm:$0xff] }
 0x219   :  { %v1639_v27 = vmax.f32 %v1617_v13, 0.0  ;;  %v4249_v6 = vadd.f32 %v4248_v22, %v4247_v15  ;;  %v4250_v26 = vpop.f32.mrb[58].mxu1  ;;  %v2196_v29 = vadd.f32 %v5531_v48, %v2195_v35  ;;  %v4603_v30 = vpop.f32.mrb[54].mxu0  ;;  %3198 = vmatprep.mubr.bf16.mxu0 %v2394_v19 }
 0x21a   :  { %v4251_v28 = vpop.f32.mrb[59].mxu1  ;;  %v2288_v14 = vmax.f32 %v2204_v20, 0.0  ;;  %v2207_v31 = vadd.f32 %v4603_v30, %v5531_v48  ;;  %v2198_v36 = vpop.f32.mrb[55].mxu0  ;;  %3199 = vmatmul.mubr.bf16.vlgmr.msra.gmra.mrb[72].mxu0 %v2378_v33  ;;  %v4883_v33 = vld [vmem:[%s5921_s3 + $0x1e0] sm:$0xff]  }
 0x21b   :  { %v1645_v38 = vpack.c.bf16 %v1639_v27, %v1638_v25  ;;  %v1557_v39 = vadd.f32 %v4249_v6, %v5526_v50  ;;  %v4252_v40 = vadd.f32 %v4251_v28, %v4250_v26  ;;  %v2286_v43 = vmax.f32 %v2196_v29, 0.0  ;;  %4426 = vmatpush3.bf16.msra.mxu0 %v4866_v21  ;;  %v4873_v50 = vld [vmem:[%s5921_s3 + $0x1d0] sm:$0xff]  }
 0x21c   :  { %2320 = vst [vmem:[#allocation2 + $0xc1] sm:$0xff] %v2288_v14  ;;  %v2289_v47 = vmax.f32 %v2207_v31, 0.0  ;;  %v2199_v44 = vadd.f32 %v5531_v48, %v2198_v36  ;;  %4427 = vmatprep.subr.bf16.mxu0 %v4869_v23  ;;  %v4864_v14 = vld [vmem:[%s5927_s9] sm:$0xff]  }
 0x21d   :  { %v1622_v41 = vadd.f32 %v5520_v42, %v1557_v39  ;;  %v1560_v16 = vadd.f32 %v4252_v40, %v5533_v52  ;;  %4569 = vmatmul.mubr.bf16.vlgmr.msra.gmra.mrb[64].mxu1 %v1645_v38  ;;  %2318 = vst [vmem:[#allocation2 + $0xa9] sm:$0xff] %v2286_v43  ;;  %v2373_v59 = vld [vmem:[#allocation2 + $0x92] ss:$2 sm:$0xff]  ;;  %v4889_v40 = vld [vmem:[%s5921_s3 + $0x1a8] sm:$0xff]  }
 0x21e   :  { %4577 = vmatpush3.bf16.msra.mxu1 %v5464_v11  ;;  %2321 = vst [vmem:[#allocation2 + $0xc9] sm:$0xff] %v2289_v47  ;;  %v2287_v54 = vmax.f32 %v2199_v44, 0.0  ;;  %v4879_v11 = vld [vmem:[%s5921_s3 + $0x1d8] sm:$0xff]   ;;  %v2379_v20 = vpack.c.bf16 %v2373_v59, %v2372_v10  ;;  %v2354_v59 = vld [vmem:[#allocation2 + $0x1] ss:$2 sm:$0xff] }
 0x21f   :  { %v1625_v55 = vadd.f32 %v5524_v49, %v1560_v16  ;;  %v4253_v57 = vpop.f32.mrb[60].mxu1  ;;  %v4606_v46 = vpop.f32.mrb[56].mxu0  ;;  %4305 = vmatprep.subr.bf16.mxu1 %v4865_v51  ;;  %4428 = vmatpush3.bf16.msra.mxu0 %v4871_v45  ;;  %v1640_v60 = vmax.f32 %v1622_v41, 0.0  ;;  %v2388_v15 = vld [vmem:[#allocation2 + $0x78] ss:$2 sm:$0xff]  ;;  %v4891_v51 = vld [vmem:[%s5921_s3 + $0x1f0] sm:$0xff]  }
 0x220   :  { %v4254_v24 = vpop.f32.mrb[61].mxu1  ;;  %2319 = vst [vmem:[#allocation2 + $0xb1] sm:$0xff] %v2287_v54  ;;  %v2220_v42 = vadd.f32 %v4606_v46, %v5531_v48  ;;  %v2211_v52 = vpop.f32.mrb[57].mxu0  ;;  %4429 = vmatprep.subr.bf16.mxu0 %v4873_v50  ;;  %v4893_v50 = vld [vmem:[%s5921_s3 + $0x1b0] sm:$0xff]   ;;  %v4867_v41 = vld [vmem:[%s5927_s9 + $0x8] sm:$0xff]   ;;  %v4868_v46 = vld [vmem:[%s5921_s3] sm:$0xff]  }
 0x221   :  { %v1641_v49 = vmax.f32 %v1625_v55, 0.0  ;;  %v4255_v18 = vadd.f32 %v4254_v24, %v4253_v57  ;;  %v4256_v63 = vpop.f32.mrb[62].mxu1  ;;  %v2212_v56 = vadd.f32 %v5531_v48, %v2211_v52  ;;  %v4607_v0 = vpop.f32.mrb[58].mxu0  ;;  %v4895_v55 = vld [vmem:[%s5921_s3 + $0x1f8] sm:$0xff]  }
 0x222   :  { %v4257_v32 = vpop.f32.mrb[63].mxu1  ;;  %v2292_v1 = vmax.f32 %v2220_v42, 0.0  ;;  %v2223_v2 = vadd.f32 %v4607_v0, %v5531_v48  ;;  %v2214_v3 = vpop.f32.mrb[59].mxu0  ;;  %v4874_v42 = vld [vmem:[%s5927_s9 + $0x10] sm:$0xff]   ;;  %v4897_v0 = vld [vmem:[%s5921_s3 + $0x1b8] sm:$0xff]  }
 0x223   :  { %v1565_v4 = vadd.f32 %v4255_v18, %v5542_v12  ;;  %v4258_v5 = vadd.f32 %v4257_v32, %v4256_v63  ;;  %v1646_v61 = vpack.c.bf16 %v1641_v49, %v1640_v60  ;;  %v2290_v7 = vmax.f32 %v2212_v56, 0.0  ;;  %4430 = vmatpush3.bf16.msra.mxu0 %v4876_v58  ;;  %v4870_v60 = vld [vmem:[%s5921_s3 + $0x48] sm:$0xff]   ;;  %v4877_v10 = vld [vmem:[%s5927_s9 + $0x18] sm:$0xff]  }
 0x224   :  { %2324 = vst [vmem:[#allocation2 + $0xf1] sm:$0xff] %v2292_v1  ;;  %v2293_v53 = vmax.f32 %v2223_v2, 0.0  ;;  %v2215_v9 = vadd.f32 %v5531_v48, %v2214_v3  ;;  %4431 = vmatprep.subr.bf16.mxu0 %v4879_v11  ;;  %v4872_v1 = vld [vmem:[%s5921_s3 + $0x8] sm:$0xff]  }
 0x225   :  { %v1630_v12 = vadd.f32 %v5518_v34, %v1565_v4  ;;  %v1568_v13 = vadd.f32 %v4258_v5, %v5545_v62  ;;  %4572 = vmatprep.mubr.bf16.mxu1 %v1646_v61  ;;  %2322 = vst [vmem:[#allocation2 + $0xd9] sm:$0xff] %v2290_v7  ;;  %v4885_v34 = vld [vmem:[%s5921_s3 + $0x1a0] sm:$0xff]   ;;  %v4875_v5 = vld [vmem:[%s5921_s3 + $0x50] sm:$0xff]  }
 0x226   :  { %2325 = vst [vmem:[#allocation2 + $0xf9] sm:$0xff] %v2293_v53  ;;  %v2291_v17 = vmax.f32 %v2215_v9, 0.0  ;;  %v2374_v49 = vld [vmem:[#allocation2 + $0xc2] ss:$2 sm:$0xff] }
 0x227   :  { %v1633_v19 = vadd.f32 %v5522_v37, %v1568_v13  ;;  %v4610_v21 = vpop.f32.mrb[60].mxu0  ;;  %v2389_v22 = vld [vmem:[#allocation2 + $0xa8] ss:$2 sm:$0xff]  ;;  %4432 = vmatpush3.bf16.msra.mxu0 %v4881_v8  ;;  %v1642_v62 = vmax.f32 %v1630_v12, 0.0 }
 0x228   :  { %2323 = vst [vmem:[#allocation2 + $0xe1] sm:$0xff] %v2291_v17  ;;  %v2236_v35 = vadd.f32 %v4610_v21, %v5531_v48  ;;  %v2227_v23 = vpop.f32.mrb[61].mxu0  ;;  %v2395_v25 = vpack.c.bf16 %v2389_v22, %v2388_v15  ;;  %4433 = vmatprep.subr.bf16.mxu0 %v4883_v33  ;;  %v4887_v37 = vld [vmem:[%s5921_s3 + $0x1e8] sm:$0xff]   ;;  %v2355_v33 = vld [vmem:[#allocation2 + $0x31] ss:$2 sm:$0xff] }
 0x229   :  { %v1643_v27 = vmax.f32 %v1633_v19, 0.0  ;;  %v2228_v6 = vadd.f32 %v5531_v48, %v2227_v23  ;;  %v4611_v26 = vpop.f32.mrb[62].mxu0  ;;  %v4878_v17 = vld [vmem:[%s5921_s3 + $0x10] sm:$0xff]   ;;  %v4880_v22 = vld [vmem:[%s5921_s3 + $0x58] sm:$0xff]  }
 0x22a   :  { %v2296_v29 = vmax.f32 %v2236_v35, 0.0  ;;  %v2239_v30 = vadd.f32 %v4611_v26, %v5531_v48  ;;  %v2230_v28 = vpop.f32.mrb[63].mxu0  ;;  %3206 = vmatprep.mubr.bf16.mxu0 %v2395_v25  ;;  %v2362_v35 = vpack.c.bf16 %v2355_v33, %v2354_v59  ;;  %v4882_v25 = vld [vmem:[%s5921_s3 + $0x18] sm:$0xff]  }
 0x22b   :  { %v1647_v31 = vpack.c.bf16 %v1643_v27, %v1642_v62  ;;  %v2294_v36 = vmax.f32 %v2228_v6, 0.0  ;;  %v2231_v38 = vadd.f32 %v5531_v48, %v2230_v28  ;;  %3207 = vmatmul.mubr.bf16.gmra.mrb[76].mxu0 %v2379_v20  ;;  %v4888_v62 = vld [vmem:[%s5921_s3 + $0x68] sm:$0xff]   ;;  %v2450_v28 = vld [vmem:[#allocation2 + $0x31] ss:$2 sm:$0xff] }
 0x22c   :  { %2328 = vst [vmem:[#allocation2 + $0x121] sm:$0xff] %v2296_v29  ;;  %v2297_v39 = vmax.f32 %v2239_v30, 0.0  ;;  %4434 = vmatpush3.bf16.msra.mxu0 %v4885_v34  ;;  %v4886_v34 = vld [vmem:[%s5921_s3 + $0x20] sm:$0xff]   ;;  %v4906_v33 = vld [vmem:[%s5921_s3 + $0x118] sm:$0xff]  }
 0x22d   :  { %4573 = vmatmul.mubr.bf16.gmra.mrb[68].mxu1 %v1647_v31  ;;  %2326 = vst [vmem:[#allocation2 + $0x109] sm:$0xff] %v2294_v36  ;;  %v2295_v43 = vmax.f32 %v2231_v38, 0.0  ;;  %4435 = vmatprep.subr.bf16.mxu0 %v4887_v37  ;;  %v2375_v18 = vld [vmem:[#allocation2 + $0xf2] ss:$2 sm:$0xff]  ;;  %v4890_v37 = vld [vmem:[%s5921_s3 + $0x28] sm:$0xff]  }
 0x22e   :  { %2329 = vst [vmem:[#allocation2 + $0x129] sm:$0xff] %v2297_v39  ;;  %4578 = vmatprep.mubr.msk.bf16.mxu1 %vm204_vm0, %v4864_v14  ;;  %v2380_v3 = vpack.c.bf16 %v2375_v18, %v2374_v49  ;;  %v2451_v14 = vld [vmem:[#allocation2 + $0x61] ss:$2 sm:$0xff]  ;;  %v4892_v36 = vld [vmem:[%s5921_s3 + $0x70] sm:$0xff]  }
 0x22f   :  { %2327 = vst [vmem:[#allocation2 + $0x111] sm:$0xff] %v2295_v43  ;;  %v4614_v45 = vpop.f32.mrb[64].mxu0  ;;  %v2390_v56 = vld [vmem:[#allocation2 + $0xd8] ss:$2 sm:$0xff]  ;;  %v2458_v38 = vpack.c.bf16 %v2451_v14, %v2450_v28  ;;  %v4894_v39 = vld [vmem:[%s5921_s3 + $0x30] sm:$0xff]   ;;  %v4902_v49 = vld [vmem:[%s5921_s3 + $0x108] sm:$0xff]  }
 0x230   :  { %v2252_v47 = vadd.f32 %v4614_v45, %v5531_v48  ;;  %v2243_v44 = vpop.f32.mrb[65].mxu0  ;;  %4436 = vmatpush3.bf16.msra.mxu0 %v4889_v40  ;;  %v4896_v40 = vld [vmem:[%s5921_s3 + $0x78] sm:$0xff]   ;;  %v4912_v28 = vld [vmem:[%s5921_s3 + $0x130] sm:$0xff]  }
 0x231   :  { %v2244_v16 = vadd.f32 %v5531_v48, %v2243_v44  ;;  %v4615_v54 = vpop.f32.mrb[66].mxu0  ;;  %4437 = vmatprep.subr.bf16.mxu0 %v4891_v51  ;;  %v2434_v43 = vld [vmem:[#allocation2 + $0x30] ss:$2 sm:$0xff]  ;;  %v2435_v51 = vld [vmem:[#allocation2 + $0x60] ss:$2 sm:$0xff] }
 0x232   :  { %v2300_v57 = vmax.f32 %v2252_v47, 0.0  ;;  %v2255_v58 = vadd.f32 %v4615_v54, %v5531_v48  ;;  %v2246_v24 = vpop.f32.mrb[67].mxu0  ;;  %v4898_v45 = vld [vmem:[%s5921_s3 + $0x38] sm:$0xff]   ;;  %v2453_v44 = vld [vmem:[#allocation2 + $0xc1] ss:$2 sm:$0xff] }
 0x233   :  { %v2298_v52 = vmax.f32 %v2244_v16, 0.0  ;;  %v2247_v11 = vadd.f32 %v5531_v48, %v2246_v24  ;;  %v2452_v47 = vld [vmem:[#allocation2 + $0x91] ss:$2 sm:$0xff]  ;;  %v2338_v16 = vld [vmem:[#allocation2] ss:$2 sm:$0xff] }
 0x234   :  { %2332 = vst [vmem:[#allocation2 + $0x151] sm:$0xff] %v2300_v57  ;;  %v2301_v63 = vmax.f32 %v2255_v58, 0.0  ;;  %4438 = vmatpush3.bf16.msra.mxu0 %v4893_v50  ;;  %v4899_v50 = vld [vmem:[%s5921_s3 + $0x140] sm:$0xff]   ;;  %v2339_v54 = vld [vmem:[#allocation2 + $0x30] ss:$2 sm:$0xff] }
 0x235   :  { %4579 = vmatmul.mubr.msk.bf16.vlgmr.msra.gmra.mrb[64].mxu1 %vm204_vm0, %v4867_v41  ;;  %2330 = vst [vmem:[#allocation2 + $0x139] sm:$0xff] %v2298_v52  ;;  %v2299_v32 = vmax.f32 %v2247_v11, 0.0  ;;  %4439 = vmatprep.subr.bf16.mxu0 %v4895_v55  ;;  %v2376_v27 = vld [vmem:[#allocation2 + $0x122] ss:$2 sm:$0xff]  ;;  %v2442_v41 = vpack.c.bf16 %v2435_v51, %v2434_v43  ;;  %v2459_v55 = vpack.c.bf16 %v2453_v44, %v2452_v47  ;;  %v2356_v57 = vld [vmem:[#allocation2 + $0x61] ss:$2 sm:$0xff] }
 0x236   :  { %4306 = vmatpush3.bf16.msra.mxu1 %v4868_v46  ;;  %2333 = vst [vmem:[#allocation2 + $0x159] sm:$0xff] %v2301_v63  ;;  %4582 = vmatprep.mubr.msk.bf16.mxu1 %vm204_vm0, %v4874_v42  ;;  %v2391_v2 = vld [vmem:[#allocation2 + $0x108] ss:$2 sm:$0xff]  ;;  %v2357_v46 = vld [vmem:[#allocation2 + $0x91] ss:$2 sm:$0xff]  ;;  %v4900_v58 = vld [vmem:[%s5921_s3 + $0x100] sm:$0xff]   ;;  %v2346_v24 = vpack.c.bf16 %v2339_v54, %v2338_v16 }
 0x237   :  { %2331 = vst [vmem:[#allocation2 + $0x141] sm:$0xff] %v2299_v32  ;;  %v4618_v4 = vpop.f32.mrb[68].mxu0  ;;  %4307 = vmatprep.subr.bf16.mxu1 %v4870_v60  ;;  %v2396_v61 = vpack.c.bf16 %v2391_v2, %v2390_v56  ;;  %v4901_v42 = vld [vmem:[%s5921_s3 + $0x148] sm:$0xff]   ;;  %v2363_v52 = vpack.c.bf16 %v2357_v46, %v2356_v57  ;;  %v2436_v11 = vld [vmem:[#allocation2 + $0x90] ss:$2 sm:$0xff] }
 0x238   :  { %v2268_v7 = vadd.f32 %v4618_v4, %v5531_v48  ;;  %v2259_v8 = vpop.f32.mrb[69].mxu0  ;;  %4440 = vmatpush3.bf16.msra.mxu0 %v4897_v0  ;;  %v2437_v60 = vld [vmem:[#allocation2 + $0xc0] ss:$2 sm:$0xff]  ;;  %v2454_v18 = vld [vmem:[#allocation2 + $0xf1] ss:$2 sm:$0xff] }
 0x239   :  { %v2260_v53 = vadd.f32 %v5531_v48, %v2259_v8  ;;  %v4619_v9 = vpop.f32.mrb[70].mxu0  ;;  %3214 = vmatprep.mubr.bf16.mxu0 %v2396_v61  ;;  %v2455_v63 = vld [vmem:[#allocation2 + $0x121] ss:$2 sm:$0xff]  ;;  %v4903_v56 = vld [vmem:[%s5921_s3 + $0x150] sm:$0xff]   ;;  %v2443_v0 = vpack.c.bf16 %v2437_v60, %v2436_v11  ;;  %v2340_v32 = vld [vmem:[#allocation2 + $0x60] ss:$2 sm:$0xff] }
 0x23a   :  { %v2304_v12 = vmax.f32 %v2268_v7, 0.0  ;;  %4308 = vmatpush3.bf16.msra.mxu1 %v4872_v1  ;;  %v2271_v13 = vadd.f32 %v4619_v9, %v5531_v48  ;;  %v2262_v15 = vpop.f32.mrb[71].mxu0  ;;  %3215 = vmatmul.mubr.bf16.gmra.mrb[80].mxu0 %v2380_v3  ;;  %v2341_v1 = vld [vmem:[#allocation2 + $0x90] ss:$2 sm:$0xff]  ;;  %v2460_v2 = vpack.c.bf16 %v2455_v63, %v2454_v18  ;;  %v2358_v3 = vld [vmem:[#allocation2 + $0xc1] ss:$2 sm:$0xff] }
 0x23b   :  { %v2302_v19 = vmax.f32 %v2260_v53, 0.0  ;;  %v2263_v21 = vadd.f32 %v5531_v48, %v2262_v15  ;;  %4309 = vmatprep.subr.bf16.mxu1 %v4875_v5  ;;  %v4884_v48 = vld [vmem:[%s5921_s3 + $0x60] sm:$0xff]   ;;  %v2359_v4 = vld [vmem:[#allocation2 + $0xf1] ss:$2 sm:$0xff]  ;;  %v2347_v61 = vpack.c.bf16 %v2341_v1, %v2340_v32  ;;  %v4916_v44 = vld [vmem:[%s5921_s3 + $0x208] sm:$0xff]  }
 0x23c   :  { %2336 = vst [vmem:[#allocation2 + $0x181] sm:$0xff] %v2304_v12  ;;  %v2305_v20 = vmax.f32 %v2271_v13, 0.0  ;;  %v4904_v5 = vld [vmem:[%s5921_s3 + $0x110] sm:$0xff]   ;;  %v4905_v7 = vld [vmem:[%s5921_s3 + $0x158] sm:$0xff]   ;;  %v2364_v8 = vpack.c.bf16 %v2359_v4, %v2358_v3  ;;  %v2439_v59 = vld [vmem:[#allocation2 + $0x120] ss:$2 sm:$0xff] }
 0x23d   :  { %2334 = vst [vmem:[#allocation2 + $0x169] sm:$0xff] %v2302_v19  ;;  %v2303_v23 = vmax.f32 %v2263_v21, 0.0  ;;  %4583 = vmatmul.mubr.msk.bf16.gmra.mrb[68].mxu1 %vm204_vm0, %v4877_v10  ;;  %v2377_v6 = vld [vmem:[#allocation2 + $0x152] ss:$2 sm:$0xff]  ;;  %v2456_v53 = vld [vmem:[#allocation2 + $0x151] ss:$2 sm:$0xff] }
 0x23e   :  { %2337 = vst [vmem:[#allocation2 + $0x189] sm:$0xff] %v2305_v20  ;;  %4310 = vmatpush3.bf16.msra.mxu1 %v4878_v17  ;;  %3133 = vmatprep.mubr.bf16.mxu1 %v2362_v35  ;;  %v2392_v26 = vld [vmem:[#allocation2 + $0x138] ss:$2 sm:$0xff]  ;;  %v2381_v30 = vpack.c.bf16 %v2377_v6, %v2376_v27  ;;  %v2360_v21 = vld [vmem:[#allocation2 + $0x121] ss:$2 sm:$0xff]  ;;  %v4911_v27 = vld [vmem:[%s5921_s3 + $0x170] sm:$0xff]  }
 0x23f   :  { %2335 = vst [vmem:[#allocation2 + $0x171] sm:$0xff] %v2303_v23  ;;  %4311 = vmatprep.subr.bf16.mxu1 %v4880_v22  ;;  %v2438_v10 = vld [vmem:[#allocation2 + $0xf0] ss:$2 sm:$0xff]  ;;  %v4907_v12 = vld [vmem:[%s5921_s3 + $0x160] sm:$0xff]   ;;  %v2361_v22 = vld [vmem:[#allocation2 + $0x151] ss:$2 sm:$0xff] }
 0x240   :  { %v2444_v15 = vpack.c.bf16 %v2439_v59, %v2438_v10  ;;  %v2342_v17 = vld [vmem:[#allocation2 + $0xc0] ss:$2 sm:$0xff]  ;;  %v2343_v19 = vld [vmem:[#allocation2 + $0xf0] ss:$2 sm:$0xff]  ;;  %v2403_v43 = vld [vmem:[#allocation2 + $0x49] ss:$2 sm:$0xff] }
 0x241   :  { %v4908_v20 = vld [vmem:[%s5921_s3 + $0x120] sm:$0xff]   ;;  %v2348_v35 = vpack.c.bf16 %v2343_v19, %v2342_v17  ;;  %v4909_v23 = vld [vmem:[%s5921_s3 + $0x168] sm:$0xff]   ;;  %v4925_v19 = vld [vmem:[%s5923_s5 + $0x10] sm:$0xff]  }
 0x242   :  { %4312 = vmatpush3.bf16.msra.mxu1 %v4882_v25  ;;  %v2365_v25 = vpack.c.bf16 %v2361_v22, %v2360_v21  ;;  %v2420_v51 = vld [vmem:[#allocation2 + $0x7a] ss:$2 sm:$0xff]  ;;  %v2404_v16 = vld [vmem:[#allocation2 + $0x79] ss:$2 sm:$0xff]  ;;  %v2405_v54 = vld [vmem:[#allocation2 + $0xa9] ss:$2 sm:$0xff] }
 0x243   :  { %4313 = vmatprep.subr.bf16.mxu1 %v4884_v48  ;;  %v2440_v48 = vld [vmem:[#allocation2 + $0x150] ss:$2 sm:$0xff]  ;;  %v2411_v46 = vpack.c.bf16 %v2405_v54, %v2404_v16  ;;  %v2407_v11 = vld [vmem:[#allocation2 + $0x109] ss:$2 sm:$0xff]  ;;  %v2408_v32 = vld [vmem:[#allocation2 + $0x139] ss:$2 sm:$0xff] }
 0x244   :  { %v2423_v57 = vld [vmem:[#allocation2 + $0x10a] ss:$2 sm:$0xff]  ;;  %v2424_v60 = vld [vmem:[#allocation2 + $0x13a] ss:$2 sm:$0xff] }
 0x245   :  { %v2457_v9 = vld [vmem:[#allocation2 + $0x181] ss:$2 sm:$0xff]  ;;  %v2467_v3 = vld [vmem:[#allocation2 + $0x62] ss:$2 sm:$0xff]  ;;  %v4926_v21 = vld [vmem:[%s5923_s5 + $0x18] sm:$0xff]  }
 0x246   :  { %4314 = vmatpush3.bf16.msra.mxu1 %v4886_v34  ;;  %v2393_v29 = vld [vmem:[#allocation2 + $0x168] ss:$2 sm:$0xff]  ;;  %v2461_v13 = vpack.c.bf16 %v2457_v9, %v2456_v53  ;;  %v2409_v1 = vld [vmem:[#allocation2 + $0x169] ss:$2 sm:$0xff]  ;;  %v4927_v22 = vld [vmem:[%s5923_s5 + $0x20] sm:$0xff]  }
 0x247   :  { %4315 = vmatprep.subr.bf16.mxu1 %v4888_v62  ;;  %v2397_v31 = vpack.c.bf16 %v2393_v29, %v2392_v26  ;;  %v2441_v34 = vld [vmem:[#allocation2 + $0x180] ss:$2 sm:$0xff]  ;;  %v2413_v4 = vpack.c.bf16 %v2409_v1, %v2408_v32 }
 0x248   :  { %v4910_v62 = vld [vmem:[%s5921_s3 + $0x128] sm:$0xff]   ;;  %v2445_v6 = vpack.c.bf16 %v2441_v34, %v2440_v48  ;;  %v2470_v53 = vld [vmem:[#allocation2 + $0xf2] ss:$2 sm:$0xff] }
 0x249   :  { %3222 = vmatprep.mubr.bf16.mxu0 %v2397_v31  ;;  %v2344_v26 = vld [vmem:[#allocation2 + $0x120] ss:$2 sm:$0xff]  ;;  %v4913_v31 = vld [vmem:[%s5921_s3 + $0x178] sm:$0xff]  }
 0x24a   :  { %4316 = vmatpush3.bf16.msra.mxu1 %v4890_v37  ;;  %3223 = vmatmul.mubr.bf16.gmra.mrb[84].mxu0 %v2381_v30  ;;  %v2345_v37 = vld [vmem:[#allocation2 + $0x150] ss:$2 sm:$0xff]  ;;  %v4920_v63 = vld [vmem:[%s5921_s3 + $0x228] sm:$0xff]  }
 0x24b   :  { %4317 = vmatprep.subr.bf16.mxu1 %v4892_v36  ;;  %3328 = vmatprep.mubr.bf16.mxu0 %v2458_v38  ;;  %v2418_v29 = vld [vmem:[#allocation2 + $0x1a] ss:$2 sm:$0xff]  ;;  %v2419_v30 = vld [vmem:[#allocation2 + $0x4a] ss:$2 sm:$0xff]  ;;  %v2349_v14 = vpack.c.bf16 %v2345_v37, %v2344_v26 }
 0x24c   :  { %v2426_v36 = vpack.c.bf16 %v2419_v30, %v2418_v29  ;;  %v4914_v38 = vld [vmem:[%s5921_s3 + $0x138] sm:$0xff]   ;;  %v2471_v9 = vld [vmem:[#allocation2 + $0x122] ss:$2 sm:$0xff] }
 0x24d   :  { %v2476_v59 = vpack.c.bf16 %v2471_v9, %v2470_v53  ;;  %v4924_v17 = vld [vmem:[%s5923_s5 + $0x8] sm:$0xff]   ;;  %v5804_v26 = vld [vmem:[%s5925_s7] sm:$0xff]  }
 0x24e   :  { %4318 = vmatpush3.bf16.msra.mxu1 %v4894_v39  ;;  %v4915_v39 = vld [vmem:[%s5921_s3 + $0x200] sm:$0xff]  }
 0x24f   :  { %4319 = vmatprep.subr.bf16.mxu1 %v4896_v40  ;;  %v2402_v40 = vld [vmem:[#allocation2 + $0x19] ss:$2 sm:$0xff] }
 0x250   :  { %v2410_v47 = vpack.c.bf16 %v2403_v43, %v2402_v40 }
 0x252   :  { %4320 = vmatpush3.bf16.msra.mxu1 %v4898_v45  ;;  %3329 = vmatmul.mubr.bf16.vlgmr.msra.gmra.mrb[88].mxu0 %v2442_v41  ;;  %v2421_v45 = vld [vmem:[#allocation2 + $0xaa] ss:$2 sm:$0xff] }
 0x253   :  { %4385 = vmatprep.subr.bf16.mxu1 %v4899_v50  ;;  %3336 = vmatprep.mubr.bf16.mxu0 %v2459_v55  ;;  %v2427_v50 = vpack.c.bf16 %v2421_v45, %v2420_v51  ;;  %v4917_v41 = vld [vmem:[%s5921_s3 + $0x210] sm:$0xff]   ;;  %v2422_v55 = vld [vmem:[#allocation2 + $0xda] ss:$2 sm:$0xff] }
 0x255   :  { %3134 = vmatmul.mubr.bf16.vlgmr.msra.gmra.mrb[72].mxu1 %v2346_v24  ;;  %v2428_v24 = vpack.c.bf16 %v2423_v57, %v2422_v55 }
 0x256   :  { %3141 = vmatprep.mubr.bf16.mxu1 %v2363_v52  ;;  %4386 = vmatpush3.bf16.msra.mxu1 %v4900_v58  ;;  %v4918_v58 = vld [vmem:[%s5921_s3 + $0x218] sm:$0xff]  }
 0x257   :  { %4387 = vmatprep.subr.bf16.mxu1 %v4901_v42  ;;  %v4919_v42 = vld [vmem:[%s5921_s3 + $0x220] sm:$0xff]  }
 0x258   :  { %v2406_v52 = vld [vmem:[#allocation2 + $0xd9] ss:$2 sm:$0xff] }
 0x259   :  { %v2412_v18 = vpack.c.bf16 %v2407_v11, %v2406_v52 }
 0x25a   :  { %4388 = vmatpush3.bf16.msra.mxu1 %v4902_v49  ;;  %3337 = vmatmul.mubr.bf16.gmra.mrb[92].mxu0 %v2443_v0  ;;  %v2425_v49 = vld [vmem:[#allocation2 + $0x16a] ss:$2 sm:$0xff] }
 0x25b   :  { %4389 = vmatprep.subr.bf16.mxu1 %v4903_v56  ;;  %3344 = vmatprep.mubr.bf16.mxu0 %v2460_v2  ;;  %v2429_v56 = vpack.c.bf16 %v2425_v49, %v2424_v60  ;;  %v4921_v0 = vld [vmem:[%s5921_s3 + $0x230] sm:$0xff]  }
 0x25c   :  { %v2466_v2 = vld [vmem:[#allocation2 + $0x32] ss:$2 sm:$0xff] }
 0x25d   :  { %3142 = vmatmul.mubr.bf16.gmra.mrb[76].mxu1 %v2347_v61  ;;  %v2474_v61 = vpack.c.bf16 %v2467_v3, %v2466_v2 }
 0x25e   :  { %3149 = vmatprep.mubr.bf16.mxu1 %v2364_v8  ;;  %4390 = vmatpush3.bf16.msra.mxu1 %v4904_v5  ;;  %v4922_v5 = vld [vmem:[%s5921_s3 + $0x238] sm:$0xff]   ;;  %v2469_v8 = vld [vmem:[#allocation2 + $0xc2] ss:$2 sm:$0xff] }
 0x25f   :  { %4391 = vmatprep.subr.bf16.mxu1 %v4905_v7  ;;  %v2468_v7 = vld [vmem:[#allocation2 + $0x92] ss:$2 sm:$0xff] }
 0x260   :  { %v2475_v10 = vpack.c.bf16 %v2469_v8, %v2468_v7 }
 0x262   :  { %4392 = vmatpush3.bf16.msra.mxu1 %v4906_v33  ;;  %3345 = vmatmul.mubr.bf16.gmra.mrb[96].mxu0 %v2444_v15  ;;  %v2472_v33 = vld [vmem:[#allocation2 + $0x152] ss:$2 sm:$0xff] }
 0x263   :  { %4393 = vmatprep.subr.bf16.mxu1 %v4907_v12  ;;  %3352 = vmatprep.mubr.bf16.mxu0 %v2461_v13  ;;  %v2473_v12 = vld [vmem:[#allocation2 + $0x182] ss:$2 sm:$0xff] }
 0x264   :  { %v2477_v13 = vpack.c.bf16 %v2473_v12, %v2472_v33  ;;  %v4923_v15 = vld [vmem:[%s5923_s5] sm:$0xff]  }
 0x265   :  { %3150 = vmatmul.mubr.bf16.gmra.mrb[80].mxu1 %v2348_v35  ;;  %4644 = vmatprep.subr.bf16.mxu0 %v4923_v15 }
 0x266   :  { %3157 = vmatprep.mubr.bf16.mxu1 %v2365_v25  ;;  %4394 = vmatpush3.bf16.msra.mxu1 %v4908_v20  ;;  %v4928_v20 = vld [vmem:[%s5923_s5 + $0x28] sm:$0xff]  }
 0x267   :  { %4395 = vmatprep.subr.bf16.mxu1 %v4909_v23  ;;  %4645 = vmatpush3.bf16.msra.mxu0 %v4923_v15 }
 0x268   :  { %4646 = vmatprep.subr.bf16.mxu0 %v4924_v17 }
 0x26a   :  { %4396 = vmatpush3.bf16.msra.mxu1 %v4910_v62  ;;  %3353 = vmatmul.mubr.bf16.gmra.mrb[100].mxu0 %v2445_v6  ;;  %v4929_v62 = vld [vmem:[%s5923_s5 + $0x30] sm:$0xff]  }
 0x26b   :  { %4397 = vmatprep.subr.bf16.mxu1 %v4911_v27  ;;  %4647 = vmatpush3.bf16.msra.mxu0 %v4924_v17  ;;  %v4930_v27 = vld [vmem:[%s5923_s5 + $0x38] sm:$0xff]  }
 0x26c   :  { %4648 = vmatprep.subr.bf16.mxu0 %v4925_v19 }
 0x26d   :  { %3158 = vmatmul.mubr.bf16.gmra.mrb[84].mxu1 %v2349_v14 }
 0x26e   :  { %4398 = vmatpush3.bf16.msra.mxu1 %v4912_v28  ;;  %3263 = vmatprep.mubr.bf16.mxu1 %v2426_v36  ;;  %v5814_v36 = vld [vmem:[%s5924_s6] ss:$0 sm:$0xff] }
 0x26f   :  { %4399 = vmatprep.subr.bf16.mxu1 %v4913_v31  ;;  %4649 = vmatpush3.bf16.msra.mxu0 %v4925_v19 }
 0x270   :  { %4650 = vmatprep.subr.bf16.mxu0 %v4926_v21 }
 0x272   :  { %4400 = vmatpush3.bf16.msra.mxu1 %v4914_v38  ;;  %v5819_v38 = vld [vmem:[%s5926_s8] ss:$0 sm:$0xff] }
 0x273   :  { %4620 = vmatprep.subr.bf16.mxu1 %v4915_v39  ;;  %4651 = vmatpush3.bf16.msra.mxu0 %v4926_v21 }
 0x274   :  { %4652 = vmatprep.subr.bf16.mxu0 %v4927_v22 }
 0x275   :  { %3264 = vmatmul.mubr.bf16.vlgmr.msra.gmra.mrb[88].mxu1 %v2410_v47 }
 0x276   :  { %3271 = vmatprep.mubr.bf16.mxu1 %v2427_v50  ;;  %4621 = vmatpush3.bf16.msra.mxu1 %v4915_v39  ;;  %v5823_v39 = vadd.f32 %v5819_v38, %v5814_v36 }
 0x277   :  { %4622 = vmatprep.subr.bf16.mxu1 %v4916_v44  ;;  %4653 = vmatpush3.bf16.msra.mxu0 %v4927_v22 }
 0x278   :  { %4654 = vmatprep.subr.bf16.mxu0 %v4928_v20 }
 0x27a   :  { %4623 = vmatpush3.bf16.msra.mxu1 %v4916_v44 }
 0x27b   :  { %4624 = vmatprep.subr.bf16.mxu1 %v4917_v41  ;;  %4655 = vmatpush3.bf16.msra.mxu0 %v4928_v20 }
 0x27c   :  { %4656 = vmatprep.subr.bf16.mxu0 %v4929_v62 }
 0x27d   :  { %3272 = vmatmul.mubr.bf16.gmra.mrb[92].mxu1 %v2411_v46 }
 0x27e   :  { %3279 = vmatprep.mubr.bf16.mxu1 %v2428_v24  ;;  %4625 = vmatpush3.bf16.msra.mxu1 %v4917_v41 }
 0x27f   :  { %4626 = vmatprep.subr.bf16.mxu1 %v4918_v58  ;;  %4657 = vmatpush3.bf16.msra.mxu0 %v4929_v62 }
 0x280   :  { %4658 = vmatprep.subr.bf16.mxu0 %v4930_v27 }
 0x282   :  { %4627 = vmatpush3.bf16.msra.mxu1 %v4918_v58 }
 0x283   :  { %4628 = vmatprep.subr.bf16.mxu1 %v4919_v42  ;;  %4659 = vmatpush3.bf16.msra.mxu0 %v4930_v27 }
 0x284   :  { %4668 = vmatprep.subr.bf16.mxu0 %v5804_v26 }
 0x285   :  { %3280 = vmatmul.mubr.bf16.gmra.mrb[96].mxu1 %v2412_v18 }
 0x286   :  { %3287 = vmatprep.mubr.bf16.mxu1 %v2429_v56  ;;  %4629 = vmatpush3.bf16.msra.mxu1 %v4919_v42 }
 0x287   :  { %4630 = vmatprep.subr.bf16.mxu1 %v4920_v63 }
 0x28a   :  { %4631 = vmatpush3.bf16.msra.mxu1 %v4920_v63 }
 0x28b   :  { %4632 = vmatprep.subr.bf16.mxu1 %v4921_v0 }
 0x28d   :  { %3288 = vmatmul.mubr.bf16.gmra.mrb[100].mxu1 %v2413_v4 }
 0x28e   :  { %4633 = vmatpush3.bf16.msra.mxu1 %v4921_v0  ;;  %4636 = vmatprep.mubr.bf16.mxu1 %v2474_v61 }
 0x28f   :  { %4634 = vmatprep.subr.bf16.mxu1 %v4922_v5 }
 0x292   :  { %4635 = vmatpush3.bf16.msra.mxu1 %v4922_v5 }
 0x295   :  { %4637 = vmatmul.mubr.bf16.vlgmr.msra.gmra.mrb[104].mxu1 %v2475_v10 }
 0x296   :  { %4640 = vmatprep.mubr.bf16.mxu1 %v2476_v59 }
 0x29d   :  { %4641 = vmatmul.mubr.bf16.gmra.mrb[108].mxu1 %v2477_v13 }
 0x2ed   :  { %v4361_v35 = vpop.f32.mrb[72].mxu0 }
 0x2ee   :  { %v4362_v23 = vpop.f32.mrb[73].mxu0 }
 0x2ef   :  { %v5791_v25 = vadd.f32 %v4362_v23, %v4361_v35  ;;  %v4364_v48 = vpop.f32.mrb[74].mxu0 }
 0x2f0   :  { %v4365_v34 = vpop.f32.mrb[75].mxu0 }
 0x2f1   :  { %v5799_v6 = vadd.f32 %v4365_v34, %v4364_v48 }
 0x2fe   :  { %v4367_v37 = vpop.f32.mrb[76].mxu0 }
 0x2ff   :  { %v4368_v29 = vpop.f32.mrb[77].mxu0 }
 0x300   :  { %v5807_v30 = vadd.f32 %v4368_v29, %v4367_v37  ;;  %v4370_v28 = vpop.f32.mrb[78].mxu0  ;;  %v3982_v37 = vld [vmem:[%s5922_s4] ss:$0 sm:$0xff] }
 0x301   :  { %v4371_v14 = vpop.f32.mrb[79].mxu0 }
 0x302   :  { %v5809_v31 = vadd.f32 %v4371_v14, %v4370_v28 }
 0x308   :  { %v4580_v40 = vpop.f32.mrb[64].mxu1 }
 0x309   :  { %v4680_v43 = vadd.f32 %v4580_v40, %v5814_v36  ;;  %v1873_v51 = vpop.f32.mrb[65].mxu1 }
 0x30a   :  { %v4682_v45 = vadd.f32 %v5814_v36, %v1873_v51  ;;  %v4581_v47 = vpop.f32.mrb[66].mxu1 }
 0x30b   :  { %v4681_v44 = vadd.f32 %v4680_v43, %v5819_v38  ;;  %v4685_v50 = vadd.f32 %v5823_v39, %v4581_v47  ;;  %v1876_v41 = vpop.f32.mrb[67].mxu1 }
 0x30c   :  { %v4683_v16 = vadd.f32 %v4682_v45, %v5819_v38  ;;  %v4687_v54 = vadd.f32 %v5823_v39, %v1876_v41 }
 0x30d   :  { %v1914_v55 = vmax.f32 %v4681_v44, 0.0  ;;  %v1915_v57 = vmax.f32 %v4685_v50, 0.0  ;;  %v4373_v46 = vpop.f32.mrb[80].mxu0 }
 0x30e   :  { %v1912_v58 = vmax.f32 %v4683_v16, 0.0  ;;  %v1913_v24 = vmax.f32 %v4687_v54, 0.0  ;;  %v4374_v42 = vpop.f32.mrb[81].mxu0 }
 0x30f   :  { %v1922_v52 = vpack.c.bf16 %v1914_v55, %v1914_v55  ;;  %v1923_v11 = vpack.c.bf16 %v1915_v57, %v1915_v57  ;;  %v5831_v60 = vadd.f32 %v4374_v42, %v4373_v46  ;;  %v4376_v49 = vpop.f32.mrb[82].mxu0 }
 0x310   :  { %v1920_v18 = vpack.c.bf16 %v1912_v58, %v1912_v58  ;;  %v1921_v63 = vpack.c.bf16 %v1913_v24, %v1913_v24  ;;  %v4584_v56 = vpop.f32.mrb[68].mxu1  ;;  %v4377_v0 = vpop.f32.mrb[83].mxu0 }
 0x311   :  { %1931 = vst.msk [vmem:[#allocation4 + $0x8] sm:$0xf] %vm1928_vm1, %v1922_v52  ;;  %1932 = vst.msk [vmem:[#allocation4 + $0xc] sm:$0xf] %vm1928_vm1, %v1923_v11  ;;  %v4689_v32 = vadd.f32 %v5823_v39, %v4584_v56  ;;  %v1889_v1 = vpop.f32.mrb[69].mxu1  ;;  %v5836_v2 = vadd.f32 %v4377_v0, %v4376_v49 }
 0x312   :  { %1929 = vst.msk [vmem:[#allocation4] sm:$0xf] %vm1928_vm1, %v1920_v18  ;;  %1930 = vst.msk [vmem:[#allocation4 + $0x4] sm:$0xf] %vm1928_vm1, %v1921_v63  ;;  %v4691_v3 = vadd.f32 %v5823_v39, %v1889_v1  ;;  %v4585_v4 = vpop.f32.mrb[70].mxu1 }
 0x313   :  { %v1918_v5 = vmax.f32 %v4689_v32, 0.0  ;;  %v4693_v61 = vadd.f32 %v5823_v39, %v4585_v4  ;;  %v1892_v7 = vpop.f32.mrb[71].mxu1 }
 0x314   :  { %v1916_v8 = vmax.f32 %v4691_v3, 0.0  ;;  %v4695_v53 = vadd.f32 %v5823_v39, %v1892_v7 }
 0x315   :  { %v1926_v9 = vpack.c.bf16 %v1918_v5, %v1918_v5  ;;  %v1919_v10 = vmax.f32 %v4693_v61, 0.0 }
 0x316   :  { %v1924_v59 = vpack.c.bf16 %v1916_v8, %v1916_v8  ;;  %v1917_v33 = vmax.f32 %v4695_v53, 0.0 }
 0x317   :  { %1935 = vst.msk [vmem:[#allocation4 + $0x18] sm:$0xf] %vm1928_vm1, %v1926_v9  ;;  %v1927_v12 = vpack.c.bf16 %v1919_v10, %v1919_v10 }
 0x318   :  { %1933 = vst.msk [vmem:[#allocation4 + $0x10] sm:$0xf] %vm1928_vm1, %v1924_v59  ;;  %v1925_v13 = vpack.c.bf16 %v1917_v33, %v1917_v33 }
 0x319   :  { %1936 = vst.msk [vmem:[#allocation4 + $0x1c] sm:$0xf] %vm1928_vm1, %v1927_v12 }
 0x31a   :  { %1934 = vst.msk [vmem:[#allocation4 + $0x14] sm:$0xf] %vm1928_vm1, %v1925_v13 }
 0x31d   :  { %v4379_v15 = vpop.f32.mrb[84].mxu0 }
 0x31e   :  { %v4380_v17 = vpop.f32.mrb[85].mxu0 }
 0x31f   :  { %v5847_v19 = vadd.f32 %v4380_v17, %v4379_v15  ;;  %v4382_v21 = vpop.f32.mrb[86].mxu0 }
 0x320   :  { %v4383_v22 = vpop.f32.mrb[87].mxu0 }
 0x321   :  { %v5849_v20 = vadd.f32 %v4383_v22, %v4382_v21 }
 0x325   :  { %v4441_v35 = vpop.f32.mrb[88].mxu0 }
 0x326   :  { %v4442_v23 = vpop.f32.mrb[89].mxu0 }
 0x327   :  { %v5851_v48 = vadd.f32 %v4442_v23, %v4441_v35  ;;  %v4444_v34 = vpop.f32.mrb[90].mxu0 }
 0x328   :  { %v4321_v62 = vpop.f32.mrb[72].mxu1  ;;  %v4445_v27 = vpop.f32.mrb[91].mxu0 }
 0x329   :  { %v4322_v29 = vpop.f32.mrb[73].mxu1  ;;  %v5856_v28 = vadd.f32 %v4445_v27, %v4444_v34 }
 0x32a   :  { %v4323_v14 = vadd.f32 %v4322_v29, %v4321_v62  ;;  %v4324_v40 = vpop.f32.mrb[74].mxu1 }
 0x32b   :  { %v4325_v43 = vpop.f32.mrb[75].mxu1 }
 0x32c   :  { %v3136_v51 = vadd.f32 %v4323_v14, %v3982_v37  ;;  %v4326_v45 = vadd.f32 %v4325_v43, %v4324_v40 }
 0x32d   :  { %v4447_v47 = vpop.f32.mrb[92].mxu0 }
 0x32e   :  { %v3139_v44 = vadd.f32 %v4326_v45, %v3982_v37  ;;  %v4448_v50 = vpop.f32.mrb[93].mxu0  ;;  %v3201_v41 = vadd.f32 %v5791_v25, %v3136_v51 }
 0x32f   :  { %v5859_v16 = vadd.f32 %v4448_v50, %v4447_v47  ;;  %v4450_v54 = vpop.f32.mrb[94].mxu0 }
 0x330   :  { %v4327_v55 = vpop.f32.mrb[76].mxu1  ;;  %v4451_v57 = vpop.f32.mrb[95].mxu0  ;;  %v3204_v46 = vadd.f32 %v5799_v6, %v3139_v44 }
 0x331   :  { %v4328_v58 = vpop.f32.mrb[77].mxu1  ;;  %v4452_v24 = vadd.f32 %v4451_v57, %v4450_v54 }
 0x332   :  { %v4329_v42 = vadd.f32 %v4328_v58, %v4327_v55  ;;  %v4330_v52 = vpop.f32.mrb[78].mxu1 }
 0x333   :  { %v4331_v11 = vpop.f32.mrb[79].mxu1 }
 0x334   :  { %v3144_v49 = vadd.f32 %v4329_v42, %v3982_v37  ;;  %v4332_v18 = vadd.f32 %v4331_v11, %v4330_v52 }
 0x335   :  { %v4453_v63 = vpop.f32.mrb[96].mxu0 }
 0x336   :  { %v3147_v56 = vadd.f32 %v4332_v18, %v3982_v37  ;;  %v4454_v0 = vpop.f32.mrb[97].mxu0  ;;  %v3209_v32 = vadd.f32 %v5807_v30, %v3144_v49 }
 0x337   :  { %v4455_v25 = vadd.f32 %v4454_v0, %v4453_v63  ;;  %v4456_v1 = vpop.f32.mrb[98].mxu0 }
 0x338   :  { %v4333_v3 = vpop.f32.mrb[80].mxu1  ;;  %v4457_v4 = vpop.f32.mrb[99].mxu0  ;;  %v3212_v5 = vadd.f32 %v5809_v31, %v3147_v56 }
 0x339   :  { %v4334_v61 = vpop.f32.mrb[81].mxu1  ;;  %v4458_v6 = vadd.f32 %v4457_v4, %v4456_v1 }
 0x33a   :  { %v4335_v7 = vadd.f32 %v4334_v61, %v4333_v3  ;;  %v4336_v8 = vpop.f32.mrb[82].mxu1 }
 0x33b   :  { %v4337_v53 = vpop.f32.mrb[83].mxu1 }
 0x33c   :  { %v3152_v9 = vadd.f32 %v4335_v7, %v3982_v37  ;;  %v4338_v10 = vadd.f32 %v4337_v53, %v4336_v8 }
 0x33d   :  { %v4459_v59 = vpop.f32.mrb[100].mxu0 }
 0x33e   :  { %v3155_v33 = vadd.f32 %v4338_v10, %v3982_v37  ;;  %v4460_v12 = vpop.f32.mrb[101].mxu0  ;;  %v3217_v13 = vadd.f32 %v5831_v60, %v3152_v9 }
 0x33f   :  { %v4461_v15 = vadd.f32 %v4460_v12, %v4459_v59  ;;  %v4462_v30 = vpop.f32.mrb[102].mxu0 }
 0x340   :  { %v4339_v17 = vpop.f32.mrb[84].mxu1  ;;  %v4463_v21 = vpop.f32.mrb[103].mxu0  ;;  %v3220_v22 = vadd.f32 %v5836_v2, %v3155_v33 }
 0x341   :  { %v4340_v35 = vpop.f32.mrb[85].mxu1  ;;  %v4464_v31 = vadd.f32 %v4463_v21, %v4462_v30 }
 0x342   :  { %v4341_v23 = vadd.f32 %v4340_v35, %v4339_v17  ;;  %v4342_v34 = vpop.f32.mrb[86].mxu1 }
 0x343   :  { %v4343_v62 = vpop.f32.mrb[87].mxu1 }
 0x344   :  { %v3160_v27 = vadd.f32 %v4341_v23, %v3982_v37  ;;  %v4344_v29 = vadd.f32 %v4343_v62, %v4342_v34 }
 0x346   :  { %v3163_v14 = vadd.f32 %v4344_v29, %v3982_v37  ;;  %v3225_v40 = vadd.f32 %v5847_v19, %v3160_v27 }
 0x348   :  { %v4401_v43 = vpop.f32.mrb[88].mxu1  ;;  %v3228_v51 = vadd.f32 %v5849_v20, %v3163_v14 }
 0x349   :  { %v4402_v60 = vpop.f32.mrb[89].mxu1 }
 0x34a   :  { %v4403_v45 = vadd.f32 %v4402_v60, %v4401_v43  ;;  %v4404_v47 = vpop.f32.mrb[90].mxu1 }
 0x34b   :  { %v4405_v44 = vpop.f32.mrb[91].mxu1 }
 0x34c   :  { %v3266_v50 = vadd.f32 %v4403_v45, %v3201_v41  ;;  %v4406_v54 = vadd.f32 %v4405_v44, %v4404_v47 }
 0x34e   :  { %v3269_v2 = vadd.f32 %v4406_v54, %v3204_v46  ;;  %v3331_v55 = vadd.f32 %v5851_v48, %v3266_v50 }
 0x350   :  { %v4407_v57 = vpop.f32.mrb[92].mxu1  ;;  %v3334_v58 = vadd.f32 %v5856_v28, %v3269_v2 }
 0x351   :  { %v4408_v42 = vpop.f32.mrb[93].mxu1 }
 0x352   :  { %v4409_v52 = vadd.f32 %v4408_v42, %v4407_v57  ;;  %v4410_v37 = vpop.f32.mrb[94].mxu1  ;;  %v4933_v57 = vld [vmem:[%s5927_s9 + $0x28] sm:$0xff]  }
 0x353   :  { %v4411_v11 = vpop.f32.mrb[95].mxu1 }
 0x354   :  { %v3274_v19 = vadd.f32 %v4409_v52, %v3209_v32  ;;  %v4412_v49 = vadd.f32 %v4411_v11, %v4410_v37 }
 0x356   :  { %v3277_v18 = vadd.f32 %v4412_v49, %v3212_v5  ;;  %v3339_v20 = vadd.f32 %v5859_v16, %v3274_v19 }
 0x358   :  { %v4413_v63 = vpop.f32.mrb[96].mxu1  ;;  %v3342_v56 = vadd.f32 %v4452_v24, %v3277_v18 }
 0x359   :  { %v4414_v0 = vpop.f32.mrb[97].mxu1 }
 0x35a   :  { %v4415_v41 = vadd.f32 %v4414_v0, %v4413_v63  ;;  %v4416_v1 = vpop.f32.mrb[98].mxu1 }
 0x35b   :  { %v4417_v46 = vpop.f32.mrb[99].mxu1 }
 0x35c   :  { %v3282_v3 = vadd.f32 %v4415_v41, %v3217_v13  ;;  %v4418_v48 = vadd.f32 %v4417_v46, %v4416_v1 }
 0x35e   :  { %v3285_v4 = vadd.f32 %v4418_v48, %v3220_v22  ;;  %v3347_v61 = vadd.f32 %v4455_v25, %v3282_v3 }
 0x360   :  { %v4419_v28 = vpop.f32.mrb[100].mxu1  ;;  %v3350_v7 = vadd.f32 %v4458_v6, %v3285_v4 }
 0x361   :  { %v4420_v8 = vpop.f32.mrb[101].mxu1 }
 0x362   :  { %v4421_v53 = vadd.f32 %v4420_v8, %v4419_v28  ;;  %v4422_v9 = vpop.f32.mrb[102].mxu1 }
 0x363   :  { %v4423_v32 = vpop.f32.mrb[103].mxu1 }
 0x364   :  { %v3290_v10 = vadd.f32 %v4421_v53, %v3225_v40  ;;  %v4424_v5 = vadd.f32 %v4423_v32, %v4422_v9 }
 0x366   :  { %v3293_v59 = vadd.f32 %v4424_v5, %v3228_v51  ;;  %v3355_v16 = vadd.f32 %v4461_v15, %v3290_v10 }
 0x368   :  { %v4638_v33 = vpop.f32.mrb[104].mxu1  ;;  %v3358_v24 = vadd.f32 %v4464_v31, %v3293_v59 }
 0x369   :  { %v3404_v12 = vadd.f32 %v4638_v33, %v3339_v20  ;;  %v3395_v30 = vpop.f32.mrb[105].mxu1 }
 0x36a   :  { %v3396_v17 = vadd.f32 %v3395_v30, %v3331_v55  ;;  %v4639_v21 = vpop.f32.mrb[106].mxu1  ;;  %v4932_v55 = vld [vmem:[%s5927_s9 + $0x20] sm:$0xff]  }
 0x36b   :  { %v3407_v13 = vadd.f32 %v4639_v21, %v3342_v56  ;;  %v3398_v35 = vpop.f32.mrb[107].mxu1  ;;  %v3428_v25 = vmax.f32 %v3404_v12, 0.0 }
 0x36c   :  { %v3399_v22 = vadd.f32 %v3398_v35, %v3334_v58  ;;  %v3426_v6 = vmax.f32 %v3396_v17, 0.0  ;;  %v4935_v58 = vld [vmem:[%s5927_s9 + $0x38] sm:$0xff]  }
 0x36d   :  { %v3429_v23 = vmax.f32 %v3407_v13, 0.0 }
 0x36e   :  { %v3427_v34 = vmax.f32 %v3399_v22, 0.0 }
 0x36f   :  { %v3435_v62 = vpack.c.bf16 %v3429_v23, %v3428_v25 }
 0x370   :  { %v3434_v27 = vpack.c.bf16 %v3427_v34, %v3426_v6  ;;  %v4642_v29 = vpop.f32.mrb[108].mxu1 }
 0x371   :  { %v3420_v14 = vadd.f32 %v4642_v29, %v3355_v16  ;;  %v3411_v40 = vpop.f32.mrb[109].mxu1 }
 0x372   :  { %v3412_v43 = vadd.f32 %v3411_v40, %v3347_v61  ;;  %v4643_v15 = vpop.f32.mrb[110].mxu1  ;;  %4660 = vmatprep.mubr.bf16.mxu0 %v3434_v27 }
 0x373   :  { %v3423_v31 = vadd.f32 %v4643_v15, %v3358_v24  ;;  %v3414_v51 = vpop.f32.mrb[111].mxu1  ;;  %4661 = vmatmul.mubr.bf16.vlgmr.msra.gmra.mrb[104].mxu0 %v3435_v62  ;;  %v3432_v45 = vmax.f32 %v3420_v14, 0.0 }
 0x374   :  { %v3415_v60 = vadd.f32 %v3414_v51, %v3350_v7  ;;  %4669 = vmatpush3.bf16.msra.mxu0 %v5804_v26  ;;  %v3430_v44 = vmax.f32 %v3412_v43, 0.0  ;;  %v4934_v26 = vld [vmem:[%s5927_s9 + $0x30] sm:$0xff]   ;;  %s4961_s9 = smov [#allocation4]  }
 0x375   :  { %v3433_v47 = vmax.f32 %v3423_v31, 0.0  ;;  %s3733_s18 = sshll.u32 %s4961_s9, 4  ;;  %s3734_s18 = int_to_ptr.vmem [resolvable:$true] %s3733_s18 }
 0x376   :  { %v3431_v50 = vmax.f32 %v3415_v60, 0.0  ;;  %s4936_s19 = scalar_lea.vmem %s3734_s18, 1024  ;;  %p4941_p1 = scmp.lt.s32.totalorder %s3734_s18, %s3734_s18 }
 0x377   :  { %v3437_v54 = vpack.c.bf16 %v3433_v47, %v3432_v45  ;;  %p4937_p0 = scmp.ne.s32.totalorder %s3734_s18, %s4936_s19  ;;  %p4942_p2 = scmp.lt.s32.totalorder %s4936_s19, %s4936_s19 }
 0x378   :  { %v3436_v2 = vpack.c.bf16 %v3431_v50, %v3430_v44 }
 0x379   :  { %p4943_p3 = por %p4942_p2, %p4941_p1 }
 0x37a   :  { %4664 = vmatprep.mubr.bf16.mxu0 %v3436_v2 }
 0x37b   :  { %4665 = vmatmul.mubr.bf16.gmra.mrb[108].mxu0 %v3437_v54  ;;  %p4944_p4 = pnand %p4943_p3, %p4937_p0 }
 0x37c   :  { %4670 = vmatprep.mubr.msk.bf16.mxu0 %vm204_vm0, %v4932_v55 }
 0x383   :  { %4671 = vmatmul.mubr.msk.bf16.vlgmr.msra.gmra.mrb[104].mxu0 %vm204_vm0, %v4933_v57 }
 0x384   :  { %4674 = vmatprep.mubr.msk.bf16.mxu0 %vm204_vm0, %v4934_v26 }
 0x38b   :  { %4675 = vmatmul.mubr.msk.bf16.gmra.mrb[108].mxu0 %vm204_vm0, %v4935_v58 }
 0x456   :  { %v4672_v42 = vpop.f32.mrb[104].mxu0 }
 0x457   :  { %v4696_v52 = vadd.f32 %v4672_v42, %v5814_v36  ;;  %v3664_v37 = vpop.f32.mrb[105].mxu0 }
 0x458   :  { %v4698_v11 = vadd.f32 %v5814_v36, %v3664_v37  ;;  %v4673_v19 = vpop.f32.mrb[106].mxu0 }
 0x459   :  { %v4697_v49 = vadd.f32 %v4696_v52, %v5819_v38  ;;  %v4701_v18 = vadd.f32 %v5823_v39, %v4673_v19  ;;  %v3667_v20 = vpop.f32.mrb[107].mxu0 }
 0x45a   :  { %v4699_v63 = vadd.f32 %v4698_v11, %v5819_v38  ;;  %v4703_v56 = vadd.f32 %v5823_v39, %v3667_v20 }
 0x45b   :  { %v3705_v0 = vmax.f32 %v4697_v49, 0.0  ;;  %v3706_v41 = vmax.f32 %v4701_v18, 0.0 }
 0x45c   :  { %v3703_v1 = vmax.f32 %v4699_v63, 0.0  ;;  %v3704_v46 = vmax.f32 %v4703_v56, 0.0 }
 0x45d   :  { %v3713_v3 = vpack.c.bf16 %v3705_v0, %v3705_v0  ;;  %v3714_v48 = vpack.c.bf16 %v3706_v41, %v3706_v41 }
 0x45e   :  { %v3711_v4 = vpack.c.bf16 %v3703_v1, %v3703_v1  ;;  %v3712_v61 = vpack.c.bf16 %v3704_v46, %v3704_v46  ;;  %v4676_v28 = vpop.f32.mrb[108].mxu0 }
 0x45f   :  { %3722 = vst.msk [vmem:[#allocation4 + $0x28] sm:$0xf] %vm1928_vm1, %v3713_v3  ;;  %3723 = vst.msk [vmem:[#allocation4 + $0x2c] sm:$0xf] %vm1928_vm1, %v3714_v48  ;;  %v4705_v36 = vadd.f32 %v5823_v39, %v4676_v28  ;;  %v3680_v7 = vpop.f32.mrb[109].mxu0 }
 0x460   :  { %3720 = vst.msk [vmem:[#allocation4 + $0x20] sm:$0xf] %vm1928_vm1, %v3711_v4  ;;  %3721 = vst.msk [vmem:[#allocation4 + $0x24] sm:$0xf] %vm1928_vm1, %v3712_v61  ;;  %v4707_v38 = vadd.f32 %v5823_v39, %v3680_v7  ;;  %v4677_v8 = vpop.f32.mrb[110].mxu0 }
 0x461   :  { %v3709_v53 = vmax.f32 %v4705_v36, 0.0  ;;  %v4709_v9 = vadd.f32 %v5823_v39, %v4677_v8  ;;  %v3683_v32 = vpop.f32.mrb[111].mxu0 }
 0x462   :  { %v3707_v10 = vmax.f32 %v4707_v38, 0.0  ;;  %v4711_v5 = vadd.f32 %v5823_v39, %v3683_v32 }
 0x463   :  { %v3717_v59 = vpack.c.bf16 %v3709_v53, %v3709_v53  ;;  %v3710_v16 = vmax.f32 %v4709_v9, 0.0 }
 0x464   :  { %v3715_v33 = vpack.c.bf16 %v3707_v10, %v3707_v10  ;;  %v3708_v24 = vmax.f32 %v4711_v5, 0.0 }
 0x465   :  { %3726 = vst.msk [vmem:[#allocation4 + $0x38] sm:$0xf] %vm1928_vm1, %v3717_v59  ;;  %v3718_v12 = vpack.c.bf16 %v3710_v16, %v3710_v16 }
 0x466   :  { %3724 = vst.msk [vmem:[#allocation4 + $0x30] sm:$0xf] %vm1928_vm1, %v3715_v33  ;;  %v3716_v30 = vpack.c.bf16 %v3708_v24, %v3708_v24 }
 0x467   :  { %3727 = vst.msk [vmem:[#allocation4 + $0x3c] sm:$0xf] %vm1928_vm1, %v3718_v12 }
 0x468   :  { %3725 = vst.msk [vmem:[#allocation4 + $0x34] sm:$0xf] %vm1928_vm1, %v3716_v30 }
 0x469   :  { %4947 = shalt.err (!%p4944_p4)
}
 0x46a   :  { %s4948_s22 = scalar_lea.hbm %s5928_s10, 1024 }
 0x46b   :  { %p4949_p5 = scmp.ne.s32.totalorder %s5928_s10, %s4948_s22  ;;  %p4952_p6 = scmp.lt.u32.totalorder %s4948_s22, %s5928_s10 }
 0x46d   :  { %p4954_p7 = pnand %p4952_p6, %p4949_p5 }
 0x46f   :  { %4957 = shalt.err (!%p4954_p7)
}
 0x470   :  { %s4962_s27 = smov 64   ;;  %s4963_s28 = smov 4  }
 0x471   :  { %3739 = dma.vmem_to_hbm [thread:$0]  %s3734_s18, 1024, %s5928_s10, [#allocation5], %s4962_s27, %s4962_s27, %s4963_s28  }
 0x472   :  { %4958 = dma.done.wait [#allocation5], 1024  }
 0x473   :  { %4959 = vsyncadd [#allocation5], 4294966272 }
 0x474   :  { %3743 = vsyncpa [#allocation5], 1 }

</bundles_post_ra>
